<compile_context>
chip_gen: v5e
topology: v5e:2x2
jax: 0.10.0
libtpu: 0.0.40
codegen_flags: <defaults>
</compile_context>

<pallas_src>
import functools

import jax
import jax.numpy as jnp
from jax.experimental import pallas as pl
from jax.experimental.pallas import tpu as pltpu


def _round_up(x, m):
    return ((x + m - 1) // m) * m


# --------------------------- PoNetBlock kernel -------------------------------
def _ponet_block_kernel(x_ref, *refs, d, local_k, segment_k, fuse_in, last_only):
    # Refs:
    #   x_ref              : (1, L, in) activations (f32 raw input when fuse_in,
    #                        bf16 for later blocks)
    #   [win_ref, bin_ref] : fc_in weight (in, d) bf16 / bias (1, d) f32  (fuse_in only)
    #   w_ref, b_ref       : block Linear(d, 6d) weight bf16 / bias (1, 6d) f32
    #   o_ref              : (1, L, d)  or (1, 1, d) when last_only
    #   seg_ref            : (L, d) f32 VMEM scratch for segment pooling
    if fuse_in:
        win_ref, bin_ref, w_ref, b_ref, o_ref, seg_ref = refs
    else:
        w_ref, b_ref, o_ref, seg_ref = refs

    L = x_ref.shape[1]

    # ---- (optional) fused fc_in ---------------------------------------------
    if fuse_in:
        x0 = jnp.dot(x_ref[0].astype(jnp.bfloat16), win_ref[...],
                     preferred_element_type=jnp.float32) + bin_ref[...]   # (L, d) f32
        x_bf = x0.astype(jnp.bfloat16)
    else:
        x_bf = x_ref[0].astype(jnp.bfloat16)                              # (L, d) bf16

    # ---- fused projection: one (L,d)x(d,6d) bf16 MXU matmul, f32 accumulation
    h = jnp.dot(x_bf, w_ref[...], preferred_element_type=jnp.float32) + b_ref[...]
    ho = h[:, 5 * d:6 * d]                                                # (L, d) f32

    # ---- global attention branch ---------------------------------------------
    # sequence mean of hQ as a (1,L)x(L,d) MXU matvec (scale applied in f32)
    ones_row = jnp.full((1, L), 1.0, dtype=jnp.bfloat16)
    g = jnp.dot(ones_row, h[:, 0 * d:1 * d].astype(jnp.bfloat16),
                preferred_element_type=jnp.float32) * (1.0 / L)           # (1, d)
    # TODO(synk): qk / g_prime could also move to the MXU (hK @ g.T, attn.T @ hV)
    # once the kernel stops being HBM-bound; kept on VPU/XLU in f32 (O(L*d) work).
    qk = jnp.sum(h[:, 1 * d:2 * d] * g, axis=1, keepdims=True)            # (L, 1)
    qk = qk - jnp.max(qk, axis=0, keepdims=True)
    e = jnp.exp(qk)
    attn = e / jnp.sum(e, axis=0, keepdims=True)                          # softmax over seq
    g_prime = jnp.sum(attn * h[:, 2 * d:3 * d], axis=0, keepdims=True)    # (1, d)

    # ---- segment max pooling (kernel = stride = segment_k), exact in f32 ------
    n_seg = L // segment_k
    if segment_k == 1:
        s = h[:, 3 * d:4 * d]
    else:
        seg_ref[...] = h[:, 3 * d:4 * d]
        seg_max = seg_ref[pl.ds(0, n_seg, stride=segment_k), :]           # (n_seg, d)
        for j in range(1, segment_k):
            seg_max = jnp.maximum(
                seg_max, seg_ref[pl.ds(j, n_seg, stride=segment_k), :])
        # repeat_interleave back to (L, d): segment_k strided sublane stores into
        # the same scratch (no selection matmul, no per-step mask construction).
        for j in range(segment_k):
            seg_ref[pl.ds(j, n_seg, stride=segment_k), :] = seg_max
        s = seg_ref[...]                                                  # (L, d)

    # ---- g_out + s_out share the ho gate: (g' + s) * ho ------------------------
    acc = (g_prime + s) * ho                                              # (L, d) f32

    # ---- local max pooling (kernel=local_k, stride=1, padding=local_k//2) ------
    pad = local_k // 2
    hl = h[:, 4 * d:5 * d]
    if pad == 0:
        acc = acc + hl
    else:
        # -inf padded buffer + symmetric +/-off sublane rolls. Lp >= L + pad, so the
        # padding rows absorb the circular wrap in both roll directions.
        Lp = _round_up(L + pad, 8)
        buf = jnp.concatenate(
            [hl, jnp.full((Lp - L, d), -jnp.inf, dtype=jnp.float32)], axis=0)
        lmax = buf
        for off in range(1, pad + 1):
            lmax = jnp.maximum(lmax, pltpu.roll(buf, shift=off, axis=0))
            lmax = jnp.maximum(lmax, pltpu.roll(buf, shift=Lp - off, axis=0))
        acc = acc + lmax[0:L, :]
    # NOTE: l_out is intentionally NOT gated by ho (matches the PyTorch reference).

    if last_only:
        o_ref[0] = acc[L - 1:L, :].astype(o_ref.dtype)                    # (1, d)
    else:
        o_ref[0] = acc.astype(o_ref.dtype)                                # (L, d)


def ponet_block(x, w, b, *, local_k, segment_k,
                w_in=None, b_in=None, last_only=False, out_dtype=jnp.bfloat16):
    B, L, in_dim = x.shape
    d = w.shape[0]
    fuse_in = w_in is not None

    kernel = functools.partial(
        _ponet_block_kernel, d=d, local_k=local_k, segment_k=segment_k,
        fuse_in=fuse_in, last_only=last_only)

    in_specs = [pl.BlockSpec((1, L, in_dim), lambda i: (i, 0, 0))]
    args = [x]
    if fuse_in:
        in_specs += [pl.BlockSpec((in_dim, d), lambda i: (0, 0)),
                     pl.BlockSpec((1, d), lambda i: (0, 0))]
        args += [w_in, b_in]
    # TODO(synk): on v7x at large d, single-buffer these constant-index weight/bias
    # specs (pipeline_mode=pl.Buffered(1)) or DMA them once into VMEM scratch.
    in_specs += [pl.BlockSpec((d, 6 * d), lambda i: (0, 0)),
                 pl.BlockSpec((1, 6 * d), lambda i: (0, 0))]
    args += [w, b]

    if last_only:
        out_shape = jax.ShapeDtypeStruct((B, 1, d), out_dtype)
        out_spec = pl.BlockSpec((1, 1, d), lambda i: (i, 0, 0))
    else:
        out_shape = jax.ShapeDtypeStruct((B, L, d), out_dtype)
        out_spec = pl.BlockSpec((1, L, d), lambda i: (i, 0, 0))

    return pl.pallas_call(
        kernel,
        out_shape=out_shape,
        grid=(B,),
        in_specs=in_specs,
        out_specs=out_spec,
        scratch_shapes=[pltpu.VMEM((L, d), jnp.float32)],
        # TODO(synk): for very large L*d (v7x has only 64 MiB VMEM/TC) tile the
        # sequence dim with an inner pipeline (two-pass online stats for the global
        # branch, per-segment running maxima, local_k//2-row halo) and mark the
        # L-tile axis "parallel" so both v7x TensorCores get work even at B == 1.
        compiler_params=pltpu.CompilerParams(dimension_semantics=("parallel",)),
    )(*args)


# ------------------------------ output head ---------------------------------
def _head_kernel(x_ref, w1_ref, b1_ref, w2_ref, b2_ref, o_ref):
    h = (jnp.dot(x_ref[...].astype(jnp.bfloat16), w1_ref[...],
                 preferred_element_type=jnp.float32) + b1_ref[...])
    h = jnp.maximum(h, 0.0)  # ReLU
    o_ref[...] = (jnp.dot(h.astype(jnp.bfloat16), w2_ref[...],
                          preferred_element_type=jnp.float32) + b2_ref[...])


def head(x_last, w1, b1_row, w2, b2_row):
    B, H = x_last.shape
    H2 = w1.shape[1]
    O = w2.shape[1]
    Op = _round_up(O, 128)  # lane-dense output store; slice back afterwards
    if Op != O:
        w2 = jnp.pad(w2, ((0, 0), (0, Op - O)))
        b2_row = jnp.pad(b2_row, ((0, 0), (0, Op - O)))
    out = pl.pallas_call(
        _head_kernel,
        out_shape=jax.ShapeDtypeStruct((B, Op), jnp.float32),
        grid=(1,),
        in_specs=[
            pl.BlockSpec((B, H), lambda i: (0, 0)),
            pl.BlockSpec((H, H2), lambda i: (0, 0)),
            pl.BlockSpec((1, H2), lambda i: (0, 0)),
            pl.BlockSpec((H2, Op), lambda i: (0, 0)),
            pl.BlockSpec((1, Op), lambda i: (0, 0)),
        ],
        out_specs=pl.BlockSpec((B, Op), lambda i: (0, 0)),
    )(x_last, w1, b1_row, w2, b2_row)
    return out[:, :O]


# ------------------------------ full forward ---------------------------------
def ponet_forward(x, params, *, local_k, segment_k):
    B, L, _ = x.shape
    assert local_k % 2 == 1, "local_k must be odd number"
    assert L % segment_k == 0, "seq_len should be dividable by segment_k"
    blocks = params["blocks"]
    assert len(blocks) >= 1

    h = x  # raw f32 input; fc_in is fused into the first block kernel
    for i, (w, b) in enumerate(blocks):
        first = i == 0
        last = i == len(blocks) - 1
        h = ponet_block(
            h, w, b, local_k=local_k, segment_k=segment_k,
            w_in=params["w_in"] if first else None,
            b_in=params["b_in"] if first else None,
            last_only=last,
            out_dtype=jnp.float32 if last else jnp.bfloat16)

    last_row = h.reshape(B, -1)  # (B, d): only the final sequence position was stored
    out = head(last_row, params["w1"], params["b1"], params["w2"], params["b2"])
    if out.shape[-1] == 1:       # mirror torch .squeeze(-1)
        out = jnp.squeeze(out, axis=-1)
    return out


# ------------------------------ param init ----------------------------------
def _init_linear(key, fan_in, fan_out):
    kw, kb = jax.random.split(key)
    bound = 1.0 / (fan_in ** 0.5)
    w = jax.random.uniform(kw, (fan_in, fan_out), jnp.float32, -bound, bound)
    b = jax.random.uniform(kb, (fan_out,), jnp.float32, -bound, bound)
    # weights in bf16 for the MXU; biases stay f32 (added after f32 accumulation)
    # and are reshaped to a (1, N) row once here (hoisted out of the kernels).
    return w.astype(jnp.bfloat16), b.reshape(1, fan_out)


def init_params(key, input_size, hidden, output_size, num_layers):
    keys = jax.random.split(key, 3 + num_layers)
    w_in, b_in = _init_linear(keys[0], input_size, hidden)
    w1, b1 = _init_linear(keys[1], hidden, hidden // 2)
    w2, b2 = _init_linear(keys[2], hidden // 2, output_size)
    # per block: Linear(d, 6d) kept in its original (d, 6d) layout,
    # split order along the 6d axis is [Q, K, V, s, l, o]
    blocks = [_init_linear(keys[3 + i], hidden, 6 * hidden)
              for i in range(num_layers)]
    return {"w_in": w_in, "b_in": b_in, "w1": w1, "b1": b1,
            "w2": w2, "b2": b2, "blocks": blocks}


if __name__ == "__main__":
    B, L = 2, 16
    input_size, hidden, output_size = 16, 128, 1
    local_k, segment_k, num_layers = 3, 4, 2  # local_k odd, L % segment_k == 0

    key = jax.random.PRNGKey(0)
    k_x, k_p = jax.random.split(key)
    x = jax.random.normal(k_x, (B, L, input_size), jnp.float32)
    params = init_params(k_p, input_size, hidden, output_size, num_layers)

    fwd = jax.jit(functools.partial(ponet_forward,
                                    local_k=local_k, segment_k=segment_k))
    out = fwd(x, params)
    jax.block_until_ready(out)
    assert out.shape == (B,)
    print("KERNEL_OK")
</pallas_src>

<mosaic_0001>
module attributes {stable_mosaic.version = 11 : i64} {
  func.func @_ponet_block_kernel(%arg0: i32, %arg1: memref<1x16x16xf32, #tpu.memory_space<vmem>>, %arg2: memref<16x128xbf16, #tpu.memory_space<vmem>>, %arg3: memref<1x128xf32, #tpu.memory_space<vmem>>, %arg4: memref<128x768xbf16, #tpu.memory_space<vmem>>, %arg5: memref<1x768xf32, #tpu.memory_space<vmem>>, %arg6: memref<1x16x128xbf16, #tpu.memory_space<vmem>>, %arg7: memref<16x128xf32, #tpu.memory_space<vmem>>) attributes {dimension_semantics = [#tpu.dimension_semantics<parallel>], iteration_bounds = array<i64: 2>, scalar_prefetch = 0 : i64, scratch_operands = 1 : i64, tpu.core_type = #tpu.core_type<tc>, window_params = [{transform_indices = @transform_0, window_bounds = array<i64: 1, 16, 16>}, {pipeline_mode = #tpu.pipeline_mode<synchronous>, transform_indices = @transform_1, window_bounds = array<i64: 16, 128>}, {pipeline_mode = #tpu.pipeline_mode<synchronous>, transform_indices = @transform_2, window_bounds = array<i64: 1, 128>}, {pipeline_mode = #tpu.pipeline_mode<synchronous>, transform_indices = @transform_3, window_bounds = array<i64: 128, 768>}, {pipeline_mode = #tpu.pipeline_mode<synchronous>, transform_indices = @transform_4, window_bounds = array<i64: 1, 768>}, {transform_indices = @transform_5, window_bounds = array<i64: 1, 16, 128>}]} {
    %c0 = arith.constant 0 : index
    %c0_0 = arith.constant 0 : index
    %c0_1 = arith.constant 0 : index
    %0 = vector.load %arg1[%c0, %c0_0, %c0_1] : memref<1x16x16xf32, #tpu.memory_space<vmem>>, vector<1x16x16xf32>
    %1 = vector.shape_cast %0 : vector<1x16x16xf32> to vector<16x16xf32>
    %2 = arith.truncf %1 : vector<16x16xf32> to vector<16x16xbf16>
    %c0_2 = arith.constant 0 : index
    %c0_3 = arith.constant 0 : index
    %3 = vector.load %arg2[%c0_2, %c0_3] : memref<16x128xbf16, #tpu.memory_space<vmem>>, vector<16x128xbf16>
    %cst = arith.constant dense<0.000000e+00> : vector<16x128xf32>
    %4 = tpu.matmul %2, %3, %cst {dimension_numbers = #tpu.dot_dimension_numbers<[1], [0], [0], [1], [0, 0, 1, 1], [], []>} : vector<16x16xbf16>, vector<16x128xbf16>, vector<16x128xf32> -> vector<16x128xf32>
    %c0_4 = arith.constant 0 : index
    %c0_5 = arith.constant 0 : index
    %5 = vector.load %arg3[%c0_4, %c0_5] : memref<1x128xf32, #tpu.memory_space<vmem>>, vector<1x128xf32>
    %6 = vector.broadcast %5 : vector<1x128xf32> to vector<16x128xf32>
    %7 = arith.addf %4, %6 : vector<16x128xf32>
    %8 = arith.truncf %7 : vector<16x128xf32> to vector<16x128xbf16>
    %c0_6 = arith.constant 0 : index
    %c0_7 = arith.constant 0 : index
    %9 = vector.load %arg4[%c0_6, %c0_7] : memref<128x768xbf16, #tpu.memory_space<vmem>>, vector<128x768xbf16>
    %cst_8 = arith.constant dense<0.000000e+00> : vector<16x768xf32>
    %10 = tpu.matmul %8, %9, %cst_8 {dimension_numbers = #tpu.dot_dimension_numbers<[1], [0], [0], [1], [0, 0, 1, 1], [], []>} : vector<16x128xbf16>, vector<128x768xbf16>, vector<16x768xf32> -> vector<16x768xf32>
    %c0_9 = arith.constant 0 : index
    %c0_10 = arith.constant 0 : index
    %11 = vector.load %arg5[%c0_9, %c0_10] : memref<1x768xf32, #tpu.memory_space<vmem>>, vector<1x768xf32>
    %12 = vector.broadcast %11 : vector<1x768xf32> to vector<16x768xf32>
    %13 = arith.addf %10, %12 : vector<16x768xf32>
    %14 = vector.extract_strided_slice %13 {offsets = [0, 640], sizes = [16, 128], strides = [1, 1]} : vector<16x768xf32> to vector<16x128xf32>
    %cst_11 = arith.constant 1.000000e+00 : bf16
    %15 = vector.broadcast %cst_11 : bf16 to vector<1x16xbf16>
    %16 = vector.extract_strided_slice %13 {offsets = [0, 0], sizes = [16, 128], strides = [1, 1]} : vector<16x768xf32> to vector<16x128xf32>
    %17 = arith.truncf %16 : vector<16x128xf32> to vector<16x128xbf16>
    %cst_12 = arith.constant dense<0.000000e+00> : vector<1x128xf32>
    %18 = tpu.matmul %15, %17, %cst_12 {dimension_numbers = #tpu.dot_dimension_numbers<[1], [0], [0], [1], [0, 0, 1, 1], [], []>} : vector<1x16xbf16>, vector<16x128xbf16>, vector<1x128xf32> -> vector<1x128xf32>
    %cst_13 = arith.constant 6.250000e-02 : f32
    %19 = vector.broadcast %cst_13 : f32 to vector<1x128xf32>
    %20 = arith.mulf %18, %19 : vector<1x128xf32>
    %21 = vector.extract_strided_slice %13 {offsets = [0, 128], sizes = [16, 128], strides = [1, 1]} : vector<16x768xf32> to vector<16x128xf32>
    %22 = vector.broadcast %20 : vector<1x128xf32> to vector<16x128xf32>
    %23 = arith.mulf %21, %22 : vector<16x128xf32>
    %cst_14 = arith.constant dense<0.000000e+00> : vector<16xf32>
    %24 = vector.multi_reduction <add>, %23, %cst_14 [1] : vector<16x128xf32> to vector<16xf32>
    %25 = vector.shape_cast %24 : vector<16xf32> to vector<16x1xf32>
    %cst_15 = arith.constant dense<0xFF800000> : vector<1xf32>
    %26 = vector.multi_reduction <maximumf>, %25, %cst_15 [0] : vector<16x1xf32> to vector<1xf32>
    %27 = vector.shape_cast %26 : vector<1xf32> to vector<1x1xf32>
    %28 = vector.broadcast %27 : vector<1x1xf32> to vector<16x1xf32>
    %29 = arith.subf %25, %28 : vector<16x1xf32>
    %30 = math.exp %29 : vector<16x1xf32>
    %cst_16 = arith.constant dense<0.000000e+00> : vector<1xf32>
    %31 = vector.multi_reduction <add>, %30, %cst_16 [0] : vector<16x1xf32> to vector<1xf32>
    %32 = vector.shape_cast %31 : vector<1xf32> to vector<1x1xf32>
    %33 = vector.broadcast %32 : vector<1x1xf32> to vector<16x1xf32>
    %34 = arith.divf %30, %33 : vector<16x1xf32>
    %35 = vector.extract_strided_slice %13 {offsets = [0, 256], sizes = [16, 128], strides = [1, 1]} : vector<16x768xf32> to vector<16x128xf32>
    %36 = vector.broadcast %34 : vector<16x1xf32> to vector<16x128xf32>
    %37 = arith.mulf %36, %35 : vector<16x128xf32>
    %cst_17 = arith.constant dense<0.000000e+00> : vector<128xf32>
    %38 = vector.multi_reduction <add>, %37, %cst_17 [0] : vector<16x128xf32> to vector<128xf32>
    %39 = vector.shape_cast %38 : vector<128xf32> to vector<1x128xf32>
    %40 = vector.extract_strided_slice %13 {offsets = [0, 384], sizes = [16, 128], strides = [1, 1]} : vector<16x768xf32> to vector<16x128xf32>
    %c0_18 = arith.constant 0 : index
    %c0_19 = arith.constant 0 : index
    %41 = vector.load %arg7[%c0_18, %c0_19] : memref<16x128xf32, #tpu.memory_space<vmem>>, vector<16x128xf32>
    tpu.vector_store %arg7[%c0_18, %c0_19], %40 {strides = array<i32>} : memref<16x128xf32, #tpu.memory_space<vmem>>, vector<16x128xf32>,
    %c0_20 = arith.constant 0 : index
    %c0_21 = arith.constant 0 : index
    %42 = tpu.strided_load %arg7[%c0_20, %c0_21] {strides = array<i32: 4, 1>} : memref<16x128xf32, #tpu.memory_space<vmem>>, vector<4x128xf32>
    %c1 = arith.constant 1 : index
    %c0_22 = arith.constant 0 : index
    %43 = tpu.strided_load %arg7[%c1, %c0_22] {strides = array<i32: 4, 1>} : memref<16x128xf32, #tpu.memory_space<vmem>>, vector<4x128xf32>
    %44 = arith.maximumf %42, %43 : vector<4x128xf32>
    %c2 = arith.constant 2 : index
    %c0_23 = arith.constant 0 : index
    %45 = tpu.strided_load %arg7[%c2, %c0_23] {strides = array<i32: 4, 1>} : memref<16x128xf32, #tpu.memory_space<vmem>>, vector<4x128xf32>
    %46 = arith.maximumf %44, %45 : vector<4x128xf32>
    %c3 = arith.constant 3 : index
    %c0_24 = arith.constant 0 : index
    %47 = tpu.strided_load %arg7[%c3, %c0_24] {strides = array<i32: 4, 1>} : memref<16x128xf32, #tpu.memory_space<vmem>>, vector<4x128xf32>
    %48 = arith.maximumf %46, %47 : vector<4x128xf32>
    %c0_25 = arith.constant 0 : index
    %c0_26 = arith.constant 0 : index
    %49 = tpu.strided_load %arg7[%c0_25, %c0_26] {strides = array<i32: 4, 1>} : memref<16x128xf32, #tpu.memory_space<vmem>>, vector<4x128xf32>
    tpu.strided_store %arg7[%c0_25, %c0_26], %48 {strides = array<i32: 4, 1>} : memref<16x128xf32, #tpu.memory_space<vmem>>, vector<4x128xf32>
    %c1_27 = arith.constant 1 : index
    %c0_28 = arith.constant 0 : index
    %50 = tpu.strided_load %arg7[%c1_27, %c0_28] {strides = array<i32: 4, 1>} : memref<16x128xf32, #tpu.memory_space<vmem>>, vector<4x128xf32>
    tpu.strided_store %arg7[%c1_27, %c0_28], %48 {strides = array<i32: 4, 1>} : memref<16x128xf32, #tpu.memory_space<vmem>>, vector<4x128xf32>
    %c2_29 = arith.constant 2 : index
    %c0_30 = arith.constant 0 : index
    %51 = tpu.strided_load %arg7[%c2_29, %c0_30] {strides = array<i32: 4, 1>} : memref<16x128xf32, #tpu.memory_space<vmem>>, vector<4x128xf32>
    tpu.strided_store %arg7[%c2_29, %c0_30], %48 {strides = array<i32: 4, 1>} : memref<16x128xf32, #tpu.memory_space<vmem>>, vector<4x128xf32>
    %c3_31 = arith.constant 3 : index
    %c0_32 = arith.constant 0 : index
    %52 = tpu.strided_load %arg7[%c3_31, %c0_32] {strides = array<i32: 4, 1>} : memref<16x128xf32, #tpu.memory_space<vmem>>, vector<4x128xf32>
    tpu.strided_store %arg7[%c3_31, %c0_32], %48 {strides = array<i32: 4, 1>} : memref<16x128xf32, #tpu.memory_space<vmem>>, vector<4x128xf32>
    %c0_33 = arith.constant 0 : index
    %c0_34 = arith.constant 0 : index
    %53 = vector.load %arg7[%c0_33, %c0_34] : memref<16x128xf32, #tpu.memory_space<vmem>>, vector<16x128xf32>
    %54 = vector.broadcast %39 : vector<1x128xf32> to vector<16x128xf32>
    %55 = arith.addf %54, %53 : vector<16x128xf32>
    %56 = arith.mulf %55, %14 : vector<16x128xf32>
    %57 = vector.extract_strided_slice %13 {offsets = [0, 512], sizes = [16, 128], strides = [1, 1]} : vector<16x768xf32> to vector<16x128xf32>
    %cst_35 = arith.constant 0xFF800000 : f32
    %58 = vector.broadcast %cst_35 : f32 to vector<8x128xf32>
    %59 = tpu.concatenate %57, %58 in 0 : vector<16x128xf32>, vector<8x128xf32> -> vector<24x128xf32>
    %c1_i32 = arith.constant 1 : i32
    %60 = tpu.dynamic_rotate %59 by %c1_i32 dim 0 : vector<24x128xf32>, i32 -> vector<24x128xf32>
    %61 = arith.maximumf %59, %60 : vector<24x128xf32>
    %c23_i32 = arith.constant 23 : i32
    %62 = tpu.dynamic_rotate %59 by %c23_i32 dim 0 : vector<24x128xf32>, i32 -> vector<24x128xf32>
    %63 = arith.maximumf %61, %62 : vector<24x128xf32>
    %64 = vector.extract_strided_slice %63 {offsets = [0, 0], sizes = [16, 128], strides = [1, 1]} : vector<24x128xf32> to vector<16x128xf32>
    %65 = arith.addf %56, %64 : vector<16x128xf32>
    %66 = arith.truncf %65 : vector<16x128xf32> to vector<16x128xbf16>
    %c0_36 = arith.constant 0 : index
    %c0_37 = arith.constant 0 : index
    %c0_38 = arith.constant 0 : index
    %67 = vector.load %arg6[%c0_36, %c0_37, %c0_38] : memref<1x16x128xbf16, #tpu.memory_space<vmem>>, vector<1x16x128xbf16>
    %68 = vector.shape_cast %67 : vector<1x16x128xbf16> to vector<16x128xbf16>
    %69 = vector.shape_cast %66 : vector<16x128xbf16> to vector<1x16x128xbf16>
    tpu.vector_store %arg6[%c0_36, %c0_37, %c0_38], %69 {strides = array<i32>} : memref<1x16x128xbf16, #tpu.memory_space<vmem>>, vector<1x16x128xbf16>,
    return
  }
  func.func @transform_0(%arg0: i32) -> (i32, i32, i32) {
    %c0_i32 = arith.constant 0 : i32
    %c0_i32_0 = arith.constant 0 : i32
    %c0_i32_1 = arith.constant 0 : i32
    return %arg0, %c0_i32, %c0_i32_0 : i32, i32, i32
  }
  func.func @transform_1(%arg0: i32) -> (i32, i32) {
    %c0_i32 = arith.constant 0 : i32
    %c0_i32_0 = arith.constant 0 : i32
    %c0_i32_1 = arith.constant 0 : i32
    return %c0_i32, %c0_i32_0 : i32, i32
  }
  func.func @transform_2(%arg0: i32) -> (i32, i32) {
    %c0_i32 = arith.constant 0 : i32
    %c0_i32_0 = arith.constant 0 : i32
    %c0_i32_1 = arith.constant 0 : i32
    return %c0_i32, %c0_i32_0 : i32, i32
  }
  func.func @transform_3(%arg0: i32) -> (i32, i32) {
    %c0_i32 = arith.constant 0 : i32
    %c0_i32_0 = arith.constant 0 : i32
    %c0_i32_1 = arith.constant 0 : i32
    return %c0_i32, %c0_i32_0 : i32, i32
  }
  func.func @transform_4(%arg0: i32) -> (i32, i32) {
    %c0_i32 = arith.constant 0 : i32
    %c0_i32_0 = arith.constant 0 : i32
    %c0_i32_1 = arith.constant 0 : i32
    return %c0_i32, %c0_i32_0 : i32, i32
  }
  func.func @transform_5(%arg0: i32) -> (i32, i32, i32) {
    %c0_i32 = arith.constant 0 : i32
    %c0_i32_0 = arith.constant 0 : i32
    %c0_i32_1 = arith.constant 0 : i32
    return %arg0, %c0_i32, %c0_i32_0 : i32, i32, i32
  }
}

module attributes {stable_mosaic.version = 11 : i64} {
  func.func @_ponet_block_kernel(%arg0: i32, %arg1: memref<1x16x128xbf16, #tpu.memory_space<vmem>>, %arg2: memref<128x768xbf16, #tpu.memory_space<vmem>>, %arg3: memref<1x768xf32, #tpu.memory_space<vmem>>, %arg4: memref<1x1x128xf32, #tpu.memory_space<vmem>>, %arg5: memref<16x128xf32, #tpu.memory_space<vmem>>) attributes {dimension_semantics = [#tpu.dimension_semantics<parallel>], iteration_bounds = array<i64: 2>, scalar_prefetch = 0 : i64, scratch_operands = 1 : i64, tpu.core_type = #tpu.core_type<tc>, window_params = [{transform_indices = @transform_0, window_bounds = array<i64: 1, 16, 128>}, {pipeline_mode = #tpu.pipeline_mode<synchronous>, transform_indices = @transform_1, window_bounds = array<i64: 128, 768>}, {pipeline_mode = #tpu.pipeline_mode<synchronous>, transform_indices = @transform_2, window_bounds = array<i64: 1, 768>}, {transform_indices = @transform_3, window_bounds = array<i64: 1, 1, 128>}]} {
    %c0 = arith.constant 0 : index
    %c0_0 = arith.constant 0 : index
    %c0_1 = arith.constant 0 : index
    %0 = vector.load %arg1[%c0, %c0_0, %c0_1] : memref<1x16x128xbf16, #tpu.memory_space<vmem>>, vector<1x16x128xbf16>
    %1 = vector.shape_cast %0 : vector<1x16x128xbf16> to vector<16x128xbf16>
    %c0_2 = arith.constant 0 : index
    %c0_3 = arith.constant 0 : index
    %2 = vector.load %arg2[%c0_2, %c0_3] : memref<128x768xbf16, #tpu.memory_space<vmem>>, vector<128x768xbf16>
    %cst = arith.constant dense<0.000000e+00> : vector<16x768xf32>
    %3 = tpu.matmul %1, %2, %cst {dimension_numbers = #tpu.dot_dimension_numbers<[1], [0], [0], [1], [0, 0, 1, 1], [], []>} : vector<16x128xbf16>, vector<128x768xbf16>, vector<16x768xf32> -> vector<16x768xf32>
    %c0_4 = arith.constant 0 : index
    %c0_5 = arith.constant 0 : index
    %4 = vector.load %arg3[%c0_4, %c0_5] : memref<1x768xf32, #tpu.memory_space<vmem>>, vector<1x768xf32>
    %5 = vector.broadcast %4 : vector<1x768xf32> to vector<16x768xf32>
    %6 = arith.addf %3, %5 : vector<16x768xf32>
    %7 = vector.extract_strided_slice %6 {offsets = [0, 640], sizes = [16, 128], strides = [1, 1]} : vector<16x768xf32> to vector<16x128xf32>
    %cst_6 = arith.constant 1.000000e+00 : bf16
    %8 = vector.broadcast %cst_6 : bf16 to vector<1x16xbf16>
    %9 = vector.extract_strided_slice %6 {offsets = [0, 0], sizes = [16, 128], strides = [1, 1]} : vector<16x768xf32> to vector<16x128xf32>
    %10 = arith.truncf %9 : vector<16x128xf32> to vector<16x128xbf16>
    %cst_7 = arith.constant dense<0.000000e+00> : vector<1x128xf32>
    %11 = tpu.matmul %8, %10, %cst_7 {dimension_numbers = #tpu.dot_dimension_numbers<[1], [0], [0], [1], [0, 0, 1, 1], [], []>} : vector<1x16xbf16>, vector<16x128xbf16>, vector<1x128xf32> -> vector<1x128xf32>
    %cst_8 = arith.constant 6.250000e-02 : f32
    %12 = vector.broadcast %cst_8 : f32 to vector<1x128xf32>
    %13 = arith.mulf %11, %12 : vector<1x128xf32>
    %14 = vector.extract_strided_slice %6 {offsets = [0, 128], sizes = [16, 128], strides = [1, 1]} : vector<16x768xf32> to vector<16x128xf32>
    %15 = vector.broadcast %13 : vector<1x128xf32> to vector<16x128xf32>
    %16 = arith.mulf %14, %15 : vector<16x128xf32>
    %cst_9 = arith.constant dense<0.000000e+00> : vector<16xf32>
    %17 = vector.multi_reduction <add>, %16, %cst_9 [1] : vector<16x128xf32> to vector<16xf32>
    %18 = vector.shape_cast %17 : vector<16xf32> to vector<16x1xf32>
    %cst_10 = arith.constant dense<0xFF800000> : vector<1xf32>
    %19 = vector.multi_reduction <maximumf>, %18, %cst_10 [0] : vector<16x1xf32> to vector<1xf32>
    %20 = vector.shape_cast %19 : vector<1xf32> to vector<1x1xf32>
    %21 = vector.broadcast %20 : vector<1x1xf32> to vector<16x1xf32>
    %22 = arith.subf %18, %21 : vector<16x1xf32>
    %23 = math.exp %22 : vector<16x1xf32>
    %cst_11 = arith.constant dense<0.000000e+00> : vector<1xf32>
    %24 = vector.multi_reduction <add>, %23, %cst_11 [0] : vector<16x1xf32> to vector<1xf32>
    %25 = vector.shape_cast %24 : vector<1xf32> to vector<1x1xf32>
    %26 = vector.broadcast %25 : vector<1x1xf32> to vector<16x1xf32>
    %27 = arith.divf %23, %26 : vector<16x1xf32>
    %28 = vector.extract_strided_slice %6 {offsets = [0, 256], sizes = [16, 128], strides = [1, 1]} : vector<16x768xf32> to vector<16x128xf32>
    %29 = vector.broadcast %27 : vector<16x1xf32> to vector<16x128xf32>
    %30 = arith.mulf %29, %28 : vector<16x128xf32>
    %cst_12 = arith.constant dense<0.000000e+00> : vector<128xf32>
    %31 = vector.multi_reduction <add>, %30, %cst_12 [0] : vector<16x128xf32> to vector<128xf32>
    %32 = vector.shape_cast %31 : vector<128xf32> to vector<1x128xf32>
    %33 = vector.extract_strided_slice %6 {offsets = [0, 384], sizes = [16, 128], strides = [1, 1]} : vector<16x768xf32> to vector<16x128xf32>
    %c0_13 = arith.constant 0 : index
    %c0_14 = arith.constant 0 : index
    %34 = vector.load %arg5[%c0_13, %c0_14] : memref<16x128xf32, #tpu.memory_space<vmem>>, vector<16x128xf32>
    tpu.vector_store %arg5[%c0_13, %c0_14], %33 {strides = array<i32>} : memref<16x128xf32, #tpu.memory_space<vmem>>, vector<16x128xf32>,
    %c0_15 = arith.constant 0 : index
    %c0_16 = arith.constant 0 : index
    %35 = tpu.strided_load %arg5[%c0_15, %c0_16] {strides = array<i32: 4, 1>} : memref<16x128xf32, #tpu.memory_space<vmem>>, vector<4x128xf32>
    %c1 = arith.constant 1 : index
    %c0_17 = arith.constant 0 : index
    %36 = tpu.strided_load %arg5[%c1, %c0_17] {strides = array<i32: 4, 1>} : memref<16x128xf32, #tpu.memory_space<vmem>>, vector<4x128xf32>
    %37 = arith.maximumf %35, %36 : vector<4x128xf32>
    %c2 = arith.constant 2 : index
    %c0_18 = arith.constant 0 : index
    %38 = tpu.strided_load %arg5[%c2, %c0_18] {strides = array<i32: 4, 1>} : memref<16x128xf32, #tpu.memory_space<vmem>>, vector<4x128xf32>
    %39 = arith.maximumf %37, %38 : vector<4x128xf32>
    %c3 = arith.constant 3 : index
    %c0_19 = arith.constant 0 : index
    %40 = tpu.strided_load %arg5[%c3, %c0_19] {strides = array<i32: 4, 1>} : memref<16x128xf32, #tpu.memory_space<vmem>>, vector<4x128xf32>
    %41 = arith.maximumf %39, %40 : vector<4x128xf32>
    %c0_20 = arith.constant 0 : index
    %c0_21 = arith.constant 0 : index
    %42 = tpu.strided_load %arg5[%c0_20, %c0_21] {strides = array<i32: 4, 1>} : memref<16x128xf32, #tpu.memory_space<vmem>>, vector<4x128xf32>
    tpu.strided_store %arg5[%c0_20, %c0_21], %41 {strides = array<i32: 4, 1>} : memref<16x128xf32, #tpu.memory_space<vmem>>, vector<4x128xf32>
    %c1_22 = arith.constant 1 : index
    %c0_23 = arith.constant 0 : index
    %43 = tpu.strided_load %arg5[%c1_22, %c0_23] {strides = array<i32: 4, 1>} : memref<16x128xf32, #tpu.memory_space<vmem>>, vector<4x128xf32>
    tpu.strided_store %arg5[%c1_22, %c0_23], %41 {strides = array<i32: 4, 1>} : memref<16x128xf32, #tpu.memory_space<vmem>>, vector<4x128xf32>
    %c2_24 = arith.constant 2 : index
    %c0_25 = arith.constant 0 : index
    %44 = tpu.strided_load %arg5[%c2_24, %c0_25] {strides = array<i32: 4, 1>} : memref<16x128xf32, #tpu.memory_space<vmem>>, vector<4x128xf32>
    tpu.strided_store %arg5[%c2_24, %c0_25], %41 {strides = array<i32: 4, 1>} : memref<16x128xf32, #tpu.memory_space<vmem>>, vector<4x128xf32>
    %c3_26 = arith.constant 3 : index
    %c0_27 = arith.constant 0 : index
    %45 = tpu.strided_load %arg5[%c3_26, %c0_27] {strides = array<i32: 4, 1>} : memref<16x128xf32, #tpu.memory_space<vmem>>, vector<4x128xf32>
    tpu.strided_store %arg5[%c3_26, %c0_27], %41 {strides = array<i32: 4, 1>} : memref<16x128xf32, #tpu.memory_space<vmem>>, vector<4x128xf32>
    %c0_28 = arith.constant 0 : index
    %c0_29 = arith.constant 0 : index
    %46 = vector.load %arg5[%c0_28, %c0_29] : memref<16x128xf32, #tpu.memory_space<vmem>>, vector<16x128xf32>
    %47 = vector.broadcast %32 : vector<1x128xf32> to vector<16x128xf32>
    %48 = arith.addf %47, %46 : vector<16x128xf32>
    %49 = arith.mulf %48, %7 : vector<16x128xf32>
    %50 = vector.extract_strided_slice %6 {offsets = [0, 512], sizes = [16, 128], strides = [1, 1]} : vector<16x768xf32> to vector<16x128xf32>
    %cst_30 = arith.constant 0xFF800000 : f32
    %51 = vector.broadcast %cst_30 : f32 to vector<8x128xf32>
    %52 = tpu.concatenate %50, %51 in 0 : vector<16x128xf32>, vector<8x128xf32> -> vector<24x128xf32>
    %c1_i32 = arith.constant 1 : i32
    %53 = tpu.dynamic_rotate %52 by %c1_i32 dim 0 : vector<24x128xf32>, i32 -> vector<24x128xf32>
    %54 = arith.maximumf %52, %53 : vector<24x128xf32>
    %c23_i32 = arith.constant 23 : i32
    %55 = tpu.dynamic_rotate %52 by %c23_i32 dim 0 : vector<24x128xf32>, i32 -> vector<24x128xf32>
    %56 = arith.maximumf %54, %55 : vector<24x128xf32>
    %57 = vector.extract_strided_slice %56 {offsets = [0, 0], sizes = [16, 128], strides = [1, 1]} : vector<24x128xf32> to vector<16x128xf32>
    %58 = arith.addf %49, %57 : vector<16x128xf32>
    %59 = vector.extract_strided_slice %58 {offsets = [15, 0], sizes = [1, 128], strides = [1, 1]} : vector<16x128xf32> to vector<1x128xf32>
    %c0_31 = arith.constant 0 : index
    %c0_32 = arith.constant 0 : index
    %c0_33 = arith.constant 0 : index
    %60 = vector.load %arg4[%c0_31, %c0_32, %c0_33] : memref<1x1x128xf32, #tpu.memory_space<vmem>>, vector<1x1x128xf32>
    %61 = vector.shape_cast %60 : vector<1x1x128xf32> to vector<1x128xf32>
    %62 = vector.shape_cast %59 : vector<1x128xf32> to vector<1x1x128xf32>
    tpu.vector_store %arg4[%c0_31, %c0_32, %c0_33], %62 {strides = array<i32>} : memref<1x1x128xf32, #tpu.memory_space<vmem>>, vector<1x1x128xf32>,
    return
  }
  func.func @transform_0(%arg0: i32) -> (i32, i32, i32) {
    %c0_i32 = arith.constant 0 : i32
    %c0_i32_0 = arith.constant 0 : i32
    %c0_i32_1 = arith.constant 0 : i32
    return %arg0, %c0_i32, %c0_i32_0 : i32, i32, i32
  }
  func.func @transform_1(%arg0: i32) -> (i32, i32) {
    %c0_i32 = arith.constant 0 : i32
    %c0_i32_0 = arith.constant 0 : i32
    %c0_i32_1 = arith.constant 0 : i32
    return %c0_i32, %c0_i32_0 : i32, i32
  }
  func.func @transform_2(%arg0: i32) -> (i32, i32) {
    %c0_i32 = arith.constant 0 : i32
    %c0_i32_0 = arith.constant 0 : i32
    %c0_i32_1 = arith.constant 0 : i32
    return %c0_i32, %c0_i32_0 : i32, i32
  }
  func.func @transform_3(%arg0: i32) -> (i32, i32, i32) {
    %c0_i32 = arith.constant 0 : i32
    %c0_i32_0 = arith.constant 0 : i32
    %c0_i32_1 = arith.constant 0 : i32
    return %arg0, %c0_i32, %c0_i32_0 : i32, i32, i32
  }
}

module attributes {stable_mosaic.version = 11 : i64} {
  func.func @_head_kernel(%arg0: i32, %arg1: memref<2x128xf32, #tpu.memory_space<vmem>>, %arg2: memref<128x64xbf16, #tpu.memory_space<vmem>>, %arg3: memref<1x64xf32, #tpu.memory_space<vmem>>, %arg4: memref<64x128xbf16, #tpu.memory_space<vmem>>, %arg5: memref<1x128xf32, #tpu.memory_space<vmem>>, %arg6: memref<2x128xf32, #tpu.memory_space<vmem>>) attributes {dimension_semantics = [#tpu.dimension_semantics<arbitrary>], iteration_bounds = array<i64: 1>, scalar_prefetch = 0 : i64, scratch_operands = 0 : i64, tpu.core_type = #tpu.core_type<tc>, window_params = [{pipeline_mode = #tpu.pipeline_mode<synchronous>, transform_indices = @transform_0, window_bounds = array<i64: 2, 128>}, {pipeline_mode = #tpu.pipeline_mode<synchronous>, transform_indices = @transform_1, window_bounds = array<i64: 128, 64>}, {pipeline_mode = #tpu.pipeline_mode<synchronous>, transform_indices = @transform_2, window_bounds = array<i64: 1, 64>}, {pipeline_mode = #tpu.pipeline_mode<synchronous>, transform_indices = @transform_3, window_bounds = array<i64: 64, 128>}, {pipeline_mode = #tpu.pipeline_mode<synchronous>, transform_indices = @transform_4, window_bounds = array<i64: 1, 128>}, {pipeline_mode = #tpu.pipeline_mode<synchronous>, transform_indices = @transform_5, window_bounds = array<i64: 2, 128>}]} {
    %c0 = arith.constant 0 : index
    %c0_0 = arith.constant 0 : index
    %0 = vector.load %arg1[%c0, %c0_0] : memref<2x128xf32, #tpu.memory_space<vmem>>, vector<2x128xf32>
    %1 = arith.truncf %0 : vector<2x128xf32> to vector<2x128xbf16>
    %c0_1 = arith.constant 0 : index
    %c0_2 = arith.constant 0 : index
    %2 = vector.load %arg2[%c0_1, %c0_2] : memref<128x64xbf16, #tpu.memory_space<vmem>>, vector<128x64xbf16>
    %cst = arith.constant dense<0.000000e+00> : vector<2x64xf32>
    %3 = tpu.matmul %1, %2, %cst {dimension_numbers = #tpu.dot_dimension_numbers<[1], [0], [0], [1], [0, 0, 1, 1], [], []>} : vector<2x128xbf16>, vector<128x64xbf16>, vector<2x64xf32> -> vector<2x64xf32>
    %c0_3 = arith.constant 0 : index
    %c0_4 = arith.constant 0 : index
    %4 = vector.load %arg3[%c0_3, %c0_4] : memref<1x64xf32, #tpu.memory_space<vmem>>, vector<1x64xf32>
    %5 = vector.broadcast %4 : vector<1x64xf32> to vector<2x64xf32>
    %6 = arith.addf %3, %5 : vector<2x64xf32>
    %cst_5 = arith.constant 0.000000e+00 : f32
    %7 = vector.broadcast %cst_5 : f32 to vector<2x64xf32>
    %8 = arith.maximumf %6, %7 : vector<2x64xf32>
    %9 = arith.truncf %8 : vector<2x64xf32> to vector<2x64xbf16>
    %c0_6 = arith.constant 0 : index
    %c0_7 = arith.constant 0 : index
    %10 = vector.load %arg4[%c0_6, %c0_7] : memref<64x128xbf16, #tpu.memory_space<vmem>>, vector<64x128xbf16>
    %cst_8 = arith.constant dense<0.000000e+00> : vector<2x128xf32>
    %11 = tpu.matmul %9, %10, %cst_8 {dimension_numbers = #tpu.dot_dimension_numbers<[1], [0], [0], [1], [0, 0, 1, 1], [], []>} : vector<2x64xbf16>, vector<64x128xbf16>, vector<2x128xf32> -> vector<2x128xf32>
    %c0_9 = arith.constant 0 : index
    %c0_10 = arith.constant 0 : index
    %12 = vector.load %arg5[%c0_9, %c0_10] : memref<1x128xf32, #tpu.memory_space<vmem>>, vector<1x128xf32>
    %13 = vector.broadcast %12 : vector<1x128xf32> to vector<2x128xf32>
    %14 = arith.addf %11, %13 : vector<2x128xf32>
    %c0_11 = arith.constant 0 : index
    %c0_12 = arith.constant 0 : index
    %15 = vector.load %arg6[%c0_11, %c0_12] : memref<2x128xf32, #tpu.memory_space<vmem>>, vector<2x128xf32>
    tpu.vector_store %arg6[%c0_11, %c0_12], %14 {strides = array<i32>} : memref<2x128xf32, #tpu.memory_space<vmem>>, vector<2x128xf32>,
    return
  }
  func.func @transform_0(%arg0: i32) -> (i32, i32) {
    %c0_i32 = arith.constant 0 : i32
    %c0_i32_0 = arith.constant 0 : i32
    %c0_i32_1 = arith.constant 0 : i32
    return %c0_i32, %c0_i32_0 : i32, i32
  }
  func.func @transform_1(%arg0: i32) -> (i32, i32) {
    %c0_i32 = arith.constant 0 : i32
    %c0_i32_0 = arith.constant 0 : i32
    %c0_i32_1 = arith.constant 0 : i32
    return %c0_i32, %c0_i32_0 : i32, i32
  }
  func.func @transform_2(%arg0: i32) -> (i32, i32) {
    %c0_i32 = arith.constant 0 : i32
    %c0_i32_0 = arith.constant 0 : i32
    %c0_i32_1 = arith.constant 0 : i32
    return %c0_i32, %c0_i32_0 : i32, i32
  }
  func.func @transform_3(%arg0: i32) -> (i32, i32) {
    %c0_i32 = arith.constant 0 : i32
    %c0_i32_0 = arith.constant 0 : i32
    %c0_i32_1 = arith.constant 0 : i32
    return %c0_i32, %c0_i32_0 : i32, i32
  }
  func.func @transform_4(%arg0: i32) -> (i32, i32) {
    %c0_i32 = arith.constant 0 : i32
    %c0_i32_0 = arith.constant 0 : i32
    %c0_i32_1 = arith.constant 0 : i32
    return %c0_i32, %c0_i32_0 : i32, i32
  }
  func.func @transform_5(%arg0: i32) -> (i32, i32) {
    %c0_i32 = arith.constant 0 : i32
    %c0_i32_0 = arith.constant 0 : i32
    %c0_i32_1 = arith.constant 0 : i32
    return %c0_i32, %c0_i32_0 : i32, i32
  }
}

</mosaic_0001>

<bundles_post_ra>
// kernel: ponet_forward.5
= control target key start
LH: loop header
LB: loop body
LE: loop exit
PB: predicated region body
PF: predicated region fallthrough
CT: control target
= control target key end

     0   :  { %vm142_vm0 = vcmask 523264   ;;  %s305_s1 = inlined_call_operand.vmem [shape: bf16[128,64], index: 1, kind: input, shape index: {}]   ;;  %s306_s3 = inlined_call_operand.vmem [shape: bf16[64,128], index: 3, kind: input, shape index: {}]   ;;  %s307_s2 = inlined_call_operand.vmem [shape: f32[1,64], index: 2, kind: input, shape index: {}]   ;;  %s308_s0 = inlined_call_operand.vmem [shape: f32[2,128], index: 0, kind: input, shape index: {}]   ;;  %s309_s4 = inlined_call_operand.vmem [shape: f32[1,128], index: 4, kind: input, shape index: {}]   ;;  %s310_s5 = inlined_call_operand.vmem [shape: f32[2,128], index: 5, kind: output, shape index: {}]  }
   0x1   :  { %v220_v0 = vld [vmem:[%s305_s1 + $0x38] sm:$0xff]  ;;  %v219_v1 = vld [vmem:[%s305_s1 + $0x30] sm:$0xff]  ;;  %v218_v4 = vld [vmem:[%s305_s1 + $0x28] sm:$0xff] }
   0x2   :  { %91 = vmatpush.bf16.msra.mxu0 %v220_v0  ;;  %v224_v2 = vld [vmem:[%s306_s3 + $0x18] sm:$0xff]  ;;  %v223_v3 = vld [vmem:[%s306_s3 + $0x10] sm:$0xff]  ;;  %v217_v5 = vld [vmem:[%s305_s1 + $0x20] sm:$0xff] }
   0x3   :  { %150 = vmatpush.bf16.msra.mxu1 %v224_v2  ;;  %v216_v6 = vld [vmem:[%s305_s1 + $0x18] sm:$0xff]  ;;  %v215_v7 = vld [vmem:[%s305_s1 + $0x10] sm:$0xff]  ;;  %v214_v8 = vld [vmem:[%s305_s1 + $0x8] sm:$0xff] }
   0x4   :  { %v213_v9 = vld [vmem:[%s305_s1] sm:$0xff]  ;;  %v222_v12 = vld [vmem:[%s306_s3 + $0x8] sm:$0xff] }
   0x5   :  { %v21_v10 = vld [vmem:[%s308_s0] sm:$0x3] }
   0x6   :  { %92 = vmatpush.bf16.msra.mxu0 %v219_v1  ;;  %v22_v11 = vpack.c.bf16 %v21_v10, %v21_v10  ;;  %v221_v13 = vld [vmem:[%s306_s3] sm:$0xff] }
   0x7   :  { %151 = vmatpush.bf16.msra.mxu1 %v223_v3  ;;  %v225_v14 = vld [vmem:[%s307_s2] ss:$0 sm:$0xff] }
   0x8   :  { %v226_v20 = vld [vmem:[%s309_s4] ss:$0 sm:$0xff] }
   0xa   :  { %93 = vmatpush.bf16.msra.mxu0 %v218_v4 }
   0xb   :  { %152 = vmatpush.bf16.msra.mxu1 %v222_v12 }
   0xe   :  { %94 = vmatpush.bf16.msra.mxu0 %v217_v5 }
   0xf   :  { %153 = vmatpush.bf16.msra.mxu1 %v221_v13 }
  0x12   :  { %95 = vmatpush.bf16.msra.mxu0 %v216_v6 }
  0x16   :  { %96 = vmatpush.bf16.msra.mxu0 %v215_v7 }
  0x1a   :  { %97 = vmatpush.bf16.msra.mxu0 %v214_v8 }
  0x1e   :  { %98 = vmatpush.bf16.msra.mxu0 %v213_v9 }
  0x21   :  { %99 = vmatmul.bf16.vlgmr.msra.gmra.mxu0 %v22_v11 }
  0x9e   :  { %v100_v15 = vpop.f32.mrf.mxu0 }
  0x9f   :  { %v101_v16 = vadd.f32 %v225_v14, %v100_v15 }
  0xa1   :  { %v104_v17 = vmax.f32 %v101_v16, 0.0 }
  0xa3   :  { %v105_v18 = vpack.c.bf16 %v104_v17, %v104_v17 }
  0xa5   :  { %212 = vmatmul.msk.bf16.vlgmr.msra.gmra.mxu1 %vm142_vm0, %v105_v18 }
  0xa6   :  { %v102_v19 = vpop.f32.mrf.mxu0 }
 0x122   :  { %v155_v21 = vpop.f32.mrf.mxu1 }
 0x123   :  { %v156_v22 = vadd.f32 %v226_v20, %v155_v21 }
 0x125   :  { %159 = vst [vmem:[%s310_s5] sm:$0x3] %v156_v22 }
 0x12a   :  { %v157_v23 = vpop.f32.mrf.mxu1 }

// kernel: ponet_forward.4
= control target key start
LH: loop header
LB: loop body
LE: loop exit
PB: predicated region body
PF: predicated region fallthrough
CT: control target
= control target key end

     0   :  { %8 = vsyncpa [#allocation4], 0  ;;  %s1093_s12 = smov 0   ;;  %s1147_s0 = inlined_call_operand.vmem [shape: bf16[2,16,128], index: 0, kind: input, shape index: {}]   ;;  %s1148_s1 = inlined_call_operand.hbm [shape: bf16[128,768], index: 1, kind: input, shape index: {}]   ;;  %s1149_s2 = inlined_call_operand.vmem [shape: f32[1,768], index: 2, kind: input, shape index: {}]   ;;  %s1150_s3 = inlined_call_operand.vmem [shape: f32[2,1,128], index: 3, kind: output, shape index: {}]  }
   0x1 LB: > { %s124_s15 = sshll.u32 %s1148_s1, 4  ;;  %s1102_s16 = sadd.s32 4294967295, %s1067_s12   ;;  %s1067_s12 = sphi %s1093_s12, %s14_s12   ;;  %s125_s15 = int_to_ptr.hbm [resolvable:$true] %s124_s15 }
   0x2   : > { %p743_p0 = scmp.ge.s32.totalorder %s1067_s12, 1  ;;  %p113_p1 = scmp.lt.s32.totalorder %s1067_s12, 3 }
   0x3   : > { %p1007_p2 = scmp.eq.s32.totalorder %s1102_s16, 0  ;;  %s1069_s17 = smov [#allocation3]  }
   0x4   : > { %p114_p3 = pnand %p743_p0, %p113_p1  ;;  %s126_s18 = sshll.u32 %s1069_s17, 4  ;;  %s127_s18 = int_to_ptr.vmem [resolvable:$true] %s126_s18 }
   0x5   : > { %s1070_s19 = smov 384   ;;  %s1071_s20 = smov 24  }
   0x6   : > { %p1003_p4 = pneg %p114_p3  ;;  %153 = sbr.rel (%p114_p3) target bundleno = 531 (0x213), region = 32 }
   0x8   : > { %p1004_p5 = pnand %p1007_p2, %p1003_p4 }
   0xa   : > { %1006 = dma.hbm_to_vmem [thread:$0]  (!%p1004_p5), %s125_s15, 6144, %s127_s18, [#allocation4], %s1070_s19, %s1070_s19, %s1071_s20  }
   0xb   : > { %1062 = dma.done.wait (%p1007_p2), [#allocation4], 6144  }
   0xc   : > { %1064 = vsyncadd (%p1007_p2), [#allocation4], 4294961152  ;;  %v924_v0 = vld [vmem:[#allocation3 + $0x150] sm:$0xf]  ;;  %v996_v1 = vld [vmem:[#allocation3 + $0x164] sm:$0xf0] }
   0xd   : > { %v900_v2 = vld [vmem:[#allocation3 + $0x120] sm:$0xf]  ;;  %v925_v3 = vor.u32 %v996_v1, %v924_v0  ;;  %v990_v4 = vld [vmem:[#allocation3 + $0x134] sm:$0xf0]  ;;  %v876_v6 = vld [vmem:[#allocation3 + $0xf0] sm:$0xf] }
   0xe   : > { %v901_v5 = vor.u32 %v990_v4, %v900_v2  ;;  %v984_v7 = vld [vmem:[#allocation3 + $0x104] sm:$0xf0]  ;;  %v932_v8 = vld [vmem:[#allocation3 + $0x158] sm:$0xf]  ;;  %v997_v9 = vld [vmem:[#allocation3 + $0x16c] sm:$0xf0] }
   0xf   : > { %496 = vmatpush.bf16.msra.mxu0 %v925_v3  ;;  %v908_v10 = vld [vmem:[#allocation3 + $0x128] sm:$0xf]  ;;  %v991_v11 = vld [vmem:[#allocation3 + $0x13c] sm:$0xf0]  ;;  %v877_v12 = vor.u32 %v984_v7, %v876_v6  ;;  %v933_v13 = vor.u32 %v997_v9, %v932_v8  ;;  %v978_v15 = vld [vmem:[#allocation3 + $0xd4] sm:$0xf0] }
  0x10   : > { %v852_v14 = vld [vmem:[#allocation3 + $0xc0] sm:$0xf]  ;;  %v909_v16 = vor.u32 %v991_v11, %v908_v10  ;;  %v993_v17 = vld [vmem:[#allocation3 + $0x154] sm:$0xf]  ;;  %v884_v18 = vld [vmem:[#allocation3 + $0xf8] sm:$0xf] }
  0x11   : > { %524 = vmatpush.bf16.msra.mxu2 %v933_v13  ;;  %v985_v19 = vld [vmem:[#allocation3 + $0x10c] sm:$0xf0]  ;;  %v926_v20 = vld [vmem:[#allocation3 + $0x168] sm:$0xf0]  ;;  %v853_v21 = vor.u32 %v978_v15, %v852_v14  ;;  %v987_v23 = vld [vmem:[#allocation3 + $0x124] sm:$0xf] }
  0x12   : > { %v929_v22 = vor.u32 %v993_v17, %v926_v20  ;;  %v902_v24 = vld [vmem:[#allocation3 + $0x138] sm:$0xf0]  ;;  %v828_v25 = vld [vmem:[#allocation3 + $0x90] sm:$0xf]  ;;  %v972_v26 = vld [vmem:[#allocation3 + $0xa4] sm:$0xf0]  ;;  %v885_v27 = vor.u32 %v985_v19, %v884_v18 }
  0x13   : > { %497 = vmatpush.bf16.msra.mxu0 %v901_v5  ;;  %v905_v28 = vor.u32 %v987_v23, %v902_v24  ;;  %v860_v29 = vld [vmem:[#allocation3 + $0xc8] sm:$0xf]  ;;  %v979_v30 = vld [vmem:[#allocation3 + $0xdc] sm:$0xf0]  ;;  %v829_v31 = vor.u32 %v972_v26, %v828_v25  ;;  %v966_v33 = vld [vmem:[#allocation3 + $0x74] sm:$0xf0] }
  0x14   : > { %510 = vmatpush.bf16.msra.mxu1 %v929_v22  ;;  %v804_v32 = vld [vmem:[#allocation3 + $0x60] sm:$0xf]  ;;  %p176_p6 = scmp.lt.s32.totalorder %s1102_s16, 1  ;;  %v861_v34 = vor.u32 %v979_v30, %v860_v29  ;;  %v836_v35 = vld [vmem:[#allocation3 + $0x98] sm:$0xf]  ;;  %vm580_vm0 = vcmask 130048  }
  0x15   : > { %525 = vmatpush.bf16.msra.mxu2 %v909_v16  ;;  %v973_v36 = vld [vmem:[#allocation3 + $0xac] sm:$0xf0]  ;;  %v805_v37 = vor.u32 %v966_v33, %v804_v32  ;;  %v960_v39 = vld [vmem:[#allocation3 + $0x44] sm:$0xf0]  ;;  %v967_v42 = vld [vmem:[#allocation3 + $0x7c] sm:$0xf0] }
  0x16   : > { %v780_v38 = vld [vmem:[#allocation3 + $0x30] sm:$0xf]  ;;  %s1152_s16 = smov (!%p176_p6, %s1102_s16), 1  ;;  %v837_v40 = vor.u32 %v973_v36, %v836_v35  ;;  %v812_v41 = vld [vmem:[#allocation3 + $0x68] sm:$0xf] }
  0x17   : > { %498 = vmatpush.bf16.msra.mxu0 %v877_v12  ;;  %v781_v43 = vor.u32 %v960_v39, %v780_v38  ;;  %v756_v44 = vld [vmem:[#allocation3] sm:$0xf]  ;;  %v954_v45 = vld [vmem:[#allocation3 + $0x14] sm:$0xf0]  ;;  %s949_s21 = sshll.u32 %s1152_s16, 3  ;;  %v813_v46 = vor.u32 %v967_v42, %v812_v41  ;;  %s183_s29 = scalar_lea.vmem %s1150_s3, %s1152_s16 }
  0x18   : > { %511 = vmatpush.bf16.msra.mxu1 %v905_v28  ;;  %v788_v47 = vld [vmem:[#allocation3 + $0x38] sm:$0xf]  ;;  %v961_v48 = vld [vmem:[#allocation3 + $0x4c] sm:$0xf0]  ;;  %v757_v49 = vor.u32 %v954_v45, %v756_v44  ;;  %s180_s24 = scalar_lea.vmem %s1147_s0, %s949_s21  ;;  %v764_v52 = vld [vmem:[#allocation3 + $0x8] sm:$0xf] }
  0x19   : > { %526 = vmatpush.bf16.msra.mxu2 %v885_v27  ;;  %v789_v50 = vor.u32 %v961_v48, %v788_v47  ;;  %v1115_v51 = vld [vmem:[%s180_s24] sm:$0xff]  ;;  %v955_v53 = vld [vmem:[#allocation3 + $0x1c] sm:$0xf0]  ;;  %v878_v56 = vld [vmem:[#allocation3 + $0x108] sm:$0xf0] }
  0x1a   : > { %v765_v54 = vor.u32 %v955_v53, %v764_v52  ;;  %v981_v55 = vld [vmem:[#allocation3 + $0xf4] sm:$0xf]  ;;  %v975_v58 = vld [vmem:[#allocation3 + $0xc4] sm:$0xf]  ;;  %v854_v59 = vld [vmem:[#allocation3 + $0xd8] sm:$0xf0] }
  0x1b   : > { %499 = vmatpush.bf16.msra.mxu0 %v853_v21  ;;  %v881_v57 = vor.u32 %v981_v55, %v878_v56  ;;  %v857_v60 = vor.u32 %v975_v58, %v854_v59  ;;  %v969_v61 = vld [vmem:[#allocation3 + $0x94] sm:$0xf]  ;;  %v830_v62 = vld [vmem:[#allocation3 + $0xa8] sm:$0xf0]  ;;  %v963_v0 = vld [vmem:[#allocation3 + $0x64] sm:$0xf] }
  0x1c   : > { %v833_v63 = vor.u32 %v969_v61, %v830_v62  ;;  %v806_v1 = vld [vmem:[#allocation3 + $0x78] sm:$0xf0]  ;;  %v957_v3 = vld [vmem:[#allocation3 + $0x34] sm:$0xf]  ;;  %v782_v4 = vld [vmem:[#allocation3 + $0x48] sm:$0xf0] }
  0x1d   : > { %527 = vmatpush.bf16.msra.mxu2 %v861_v34  ;;  %512 = vmatpush.bf16.msra.mxu1 %v881_v57  ;;  %v809_v2 = vor.u32 %v963_v0, %v806_v1  ;;  %v785_v5 = vor.u32 %v957_v3, %v782_v4  ;;  %v951_v6 = vld [vmem:[#allocation3 + $0x4] sm:$0xf]  ;;  %v758_v7 = vld [vmem:[#allocation3 + $0x18] sm:$0xf0]  ;;  %v1123_v10 = vld [vmem:[%s1149_s2] sm:$0x3f] }
  0x1e   : > { %v761_v8 = vor.u32 %v951_v6, %v758_v7  ;;  %v238_v11 = vperm.slane %v1123_v10, 0  ;;  %v1072_v16 = vmov 1065369472   ;;  %v994_v17 = vld [vmem:[#allocation3 + $0x15c] sm:$0xf]  ;;  %v239_v6 = vperm.slane %v1123_v10, 1 }
  0x1f   : > { %500 = vmatpush.bf16.msra.mxu0 %v829_v31  ;;  %v934_v18 = vld [vmem:[#allocation3 + $0x170] sm:$0xf0]  ;;  %v988_v20 = vld [vmem:[#allocation3 + $0x12c] sm:$0xf]  ;;  %v910_v21 = vld [vmem:[#allocation3 + $0x140] sm:$0xf0] }
  0x20   : > { %v937_v19 = vor.u32 %v994_v17, %v934_v18  ;;  %v913_v22 = vor.u32 %v988_v20, %v910_v21  ;;  %v982_v23 = vld [vmem:[#allocation3 + $0xfc] sm:$0xf]  ;;  %v886_v24 = vld [vmem:[#allocation3 + $0x110] sm:$0xf0]  ;;  %v976_v26 = vld [vmem:[#allocation3 + $0xcc] sm:$0xf] }
  0x21   : > { %528 = vmatpush.bf16.msra.mxu2 %v837_v40  ;;  %513 = vmatpush.bf16.msra.mxu1 %v857_v60  ;;  %v889_v25 = vor.u32 %v982_v23, %v886_v24  ;;  %v862_v27 = vld [vmem:[#allocation3 + $0xe0] sm:$0xf0]  ;;  %v970_v29 = vld [vmem:[#allocation3 + $0x9c] sm:$0xf]  ;;  %v838_v30 = vld [vmem:[#allocation3 + $0xb0] sm:$0xf0] }
  0x22   : > { %538 = vmatpush.bf16.msra.mxu3 %v937_v19  ;;  %v865_v28 = vor.u32 %v976_v26, %v862_v27  ;;  %v841_v31 = vor.u32 %v970_v29, %v838_v30  ;;  %v964_v33 = vld [vmem:[#allocation3 + $0x6c] sm:$0xf]  ;;  %v814_v34 = vld [vmem:[#allocation3 + $0x80] sm:$0xf0]  ;;  %v958_v35 = vld [vmem:[#allocation3 + $0x3c] sm:$0xf] }
  0x23   : > { %501 = vmatpush.bf16.msra.mxu0 %v805_v37  ;;  %v817_v36 = vor.u32 %v964_v33, %v814_v34  ;;  %v790_v37 = vld [vmem:[#allocation3 + $0x50] sm:$0xf0]  ;;  %v940_v38 = vld [vmem:[#allocation3 + $0x160] sm:$0xf]  ;;  %v998_v39 = vld [vmem:[#allocation3 + $0x174] sm:$0xf0] }
  0x24   : > { %v941_v40 = vor.u32 %v998_v39, %v940_v38  ;;  %v916_v41 = vld [vmem:[#allocation3 + $0x130] sm:$0xf]  ;;  %v793_v42 = vor.u32 %v958_v35, %v790_v37  ;;  %v995_v44 = vld [vmem:[#allocation3 + $0x164] sm:$0xf]  ;;  %v942_v45 = vld [vmem:[#allocation3 + $0x178] sm:$0xf0] }
  0x25   : > { %529 = vmatpush.bf16.msra.mxu2 %v813_v46  ;;  %514 = vmatpush.bf16.msra.mxu1 %v833_v63  ;;  %v952_v46 = vld [vmem:[#allocation3 + $0xc] sm:$0xf]  ;;  %v766_v47 = vld [vmem:[#allocation3 + $0x20] sm:$0xf0]  ;;  %v892_v52 = vld [vmem:[#allocation3 + $0x100] sm:$0xf] }
  0x26   : > { %539 = vmatpush.bf16.msra.mxu3 %v913_v22  ;;  %v986_v53 = vld [vmem:[#allocation3 + $0x114] sm:$0xf0]  ;;  %v769_v56 = vor.u32 %v952_v46, %v766_v47  ;;  %v983_v57 = vld [vmem:[#allocation3 + $0x104] sm:$0xf]  ;;  %v894_v58 = vld [vmem:[#allocation3 + $0x118] sm:$0xf0] }
  0x27   : > { %502 = vmatpush.bf16.msra.mxu0 %v781_v43  ;;  %v992_v43 = vld [vmem:[#allocation3 + $0x144] sm:$0xf0]  ;;  %v893_v59 = vor.u32 %v986_v53, %v892_v52  ;;  %v868_v61 = vld [vmem:[#allocation3 + $0xd0] sm:$0xf]  ;;  %v897_v63 = vor.u32 %v983_v57, %v894_v58  ;;  %v977_v0 = vld [vmem:[#allocation3 + $0xd4] sm:$0xf] }
  0x28   : > { %v917_v48 = vor.u32 %v992_v43, %v916_v41  ;;  %v980_v62 = vld [vmem:[#allocation3 + $0xe4] sm:$0xf0]  ;;  %v870_v1 = vld [vmem:[#allocation3 + $0xe8] sm:$0xf0]  ;;  %v844_v4 = vld [vmem:[#allocation3 + $0xa0] sm:$0xf] }
  0x29   : > { %530 = vmatpush.bf16.msra.mxu2 %v789_v50  ;;  %515 = vmatpush.bf16.msra.mxu1 %v809_v2  ;;  %v989_v50 = vld [vmem:[#allocation3 + $0x134] sm:$0xf]  ;;  %v869_v2 = vor.u32 %v980_v62, %v868_v61  ;;  %v873_v7 = vor.u32 %v977_v0, %v870_v1  ;;  %v822_v19 = vld [vmem:[#allocation3 + $0x88] sm:$0xf0]  ;;  %v796_v22 = vld [vmem:[#allocation3 + $0x40] sm:$0xf] }
  0x2a   : > { %540 = vmatpush.bf16.msra.mxu3 %v889_v25  ;;  %v965_v18 = vld [vmem:[#allocation3 + $0x74] sm:$0xf]  ;;  %v962_v23 = vld [vmem:[#allocation3 + $0x54] sm:$0xf0]  ;;  %v959_v27 = vld [vmem:[#allocation3 + $0x44] sm:$0xf] }
  0x2b   : > { %503 = vmatpush.bf16.msra.mxu0 %v757_v49  ;;  %v945_v49 = vor.u32 %v995_v44, %v942_v45  ;;  %v825_v25 = vor.u32 %v965_v18, %v822_v19  ;;  %v797_v29 = vor.u32 %v962_v23, %v796_v22  ;;  %v956_v33 = vld [vmem:[#allocation3 + $0x24] sm:$0xf0]  ;;  %v774_v37 = vld [vmem:[#allocation3 + $0x28] sm:$0xf0]  ;;  %v241_v47 = vperm.slane %v1123_v10, 3 }
  0x2d   : > { %531 = vmatpush.bf16.msra.mxu2 %v765_v54  ;;  %516 = vmatpush.bf16.msra.mxu1 %v785_v5  ;;  %v918_v54 = vld [vmem:[#allocation3 + $0x148] sm:$0xf0]  ;;  %v974_v5 = vld [vmem:[#allocation3 + $0xb4] sm:$0xf0] }
  0x2e   : > { %504 = vmatmul.bf16.vlgmr.msra.gmra.mxu0 %v1115_v51  ;;  %541 = vmatpush.bf16.msra.mxu3 %v865_v28  ;;  %v921_v55 = vor.u32 %v989_v50, %v918_v54  ;;  %v798_v28 = vld [vmem:[#allocation3 + $0x58] sm:$0xf0] }
  0x2f   : > { %552 = vmatpush.bf16.msrb.mxu0 %v941_v40  ;;  %v801_v35 = vor.u32 %v959_v27, %v798_v28 }
  0x30   : > { %532 = vmatmul.bf16.vlgmr.msra.gmra.mxu2 %v1115_v51 }
  0x31   : > { %517 = vmatpush.bf16.msra.mxu1 %v761_v8  ;;  %v971_v8 = vld [vmem:[#allocation3 + $0xa4] sm:$0xf] }
  0x32   : > { %542 = vmatpush.bf16.msra.mxu3 %v841_v31  ;;  %v772_v31 = vld [vmem:[#allocation3 + $0x10] sm:$0xf] }
  0x33   : > { %553 = vmatpush.bf16.msrb.mxu0 %v917_v48  ;;  %v773_v38 = vor.u32 %v956_v33, %v772_v31 }
  0x34   : > { %518 = vmatmul.bf16.vlgmr.msra.gmra.mxu1 %v1115_v51 }
  0x35   : > { %566 = vmatpush.bf16.msrb.mxu1 %v945_v49 }
  0x36   : > { %543 = vmatpush.bf16.msra.mxu3 %v817_v36  ;;  %v953_v36 = vld [vmem:[#allocation3 + $0x14] sm:$0xf] }
  0x37   : > { %554 = vmatpush.bf16.msrb.mxu0 %v893_v59  ;;  %v777_v40 = vor.u32 %v953_v36, %v774_v37 }
  0x39   : > { %567 = vmatpush.bf16.msrb.mxu1 %v921_v55 }
  0x3a   : > { %544 = vmatpush.bf16.msra.mxu3 %v793_v42 }
  0x3b   : > { %555 = vmatpush.bf16.msrb.mxu0 %v869_v2 }
  0x3d   : > { %568 = vmatpush.bf16.msrb.mxu1 %v897_v63 }
  0x3e   : > { %545 = vmatpush.bf16.msra.mxu3 %v769_v56 }
  0x41   : > { %546 = vmatmul.bf16.vlgmr.msra.gmra.mxu3 %v1115_v51  ;;  %569 = vmatpush.bf16.msrb.mxu1 %v873_v7 }
  0xab   : > { %v505_v9 = vpop.f32.mrf.mxu0 }
  0xac   : > { %v506_v13 = vadd.f32 %v505_v9, %v238_v11  ;;  %v846_v9 = vld [vmem:[#allocation3 + $0xb8] sm:$0xf0] }
  0xad   : > { %v849_v17 = vor.u32 %v971_v8, %v846_v9 }
  0xaf   : > { %570 = vmatpush.bf16.msrb.mxu1 %v849_v17 }
  0xb1   : > { %v519_v3 = vpop.f32.mrf.mxu1 }
  0xb3   : > { %v507_v12 = vpop.f32.mrf.mxu0  ;;  %v1126_v32 = vpop.f32.mrf.mxu2  ;;  %571 = vmatpush.bf16.msrb.mxu1 %v825_v25 }
  0xb4   : > { %v508_v14 = vadd.f32 %v507_v12, %v238_v11  ;;  %v845_v11 = vor.u32 %v974_v5, %v844_v4 }
  0xb6   : > { %v579_v15 = vpack.c.bf16 %v508_v14, %v506_v13  ;;  %v820_v13 = vld [vmem:[#allocation3 + $0x70] sm:$0xf]  ;;  %v968_v14 = vld [vmem:[#allocation3 + $0x84] sm:$0xf0]  ;;  %556 = vmatpush.bf16.msrb.mxu0 %v845_v11 }
  0xb7   : > { %v821_v21 = vor.u32 %v968_v14, %v820_v13  ;;  %572 = vmatpush.bf16.msrb.mxu1 %v801_v35  ;;  %v671_v35 = vlaneseq }
  0xb8   : > { %591 = vmatpush.bf16.msrb.mxu2 %v579_v15 }
  0xb9   : > { %v521_v26 = vpop.f32.mrf.mxu1 }
  0xba   : > { %557 = vmatpush.bf16.msrb.mxu0 %v821_v21  ;;  %v522_v34 = vadd.f32 %v521_v26, %v239_v6  ;;  %v240_v21 = vperm.slane %v1123_v10, 2 }
  0xbb   : > { %946 = vmatmul.msk.bf16.vlgmr.msrb.gmra.mxu2 %vm580_vm0, %v1072_v16  ;;  %v1128_v60 = vpop.f32.mrf.mxu2  ;;  %v520_v16 = vadd.f32 %v519_v3, %v239_v6  ;;  %573 = vmatpush.bf16.msrb.mxu1 %v777_v40 }
  0xbc   : > { %v534_v26 = vadd.f32 %v1126_v32, %v240_v21  ;;  %v536_v27 = vadd.f32 %v1128_v60, %v240_v21 }
  0xbe   : > { %558 = vmatpush.bf16.msrb.mxu0 %v797_v29  ;;  %574 = vmatmul.bf16.vlgmr.msrb.gmra.mxu1 %v1115_v51 }
  0xc2   : > { %559 = vmatpush.bf16.msrb.mxu0 %v773_v38 }
  0xc4   : > { %v547_v42 = vpop.f32.mrf.mxu3 }
  0xc5   : > { %560 = vmatmul.bf16.vlgmr.msrb.gmra.mxu0 %v1115_v51  ;;  %v548_v50 = vadd.f32 %v547_v42, %v241_v47 }
  0xc7   : > { %650 = vst [vmem:[#allocation2] sm:$0xff] %v548_v50 }
  0xcc   : > { %v549_v49 = vpop.f32.mrf.mxu3 }
  0xcd   : > { %v550_v52 = vadd.f32 %v549_v49, %v241_v47 }
  0xcf   : > { %651 = vst [vmem:[#allocation2 + $0x8] sm:$0xff] %v550_v52 }
  0xd6   : > { %v652_v61 = vld [vmem:[#allocation2] ss:$4 sm:$0xf]  ;;  %v654_v62 = vld [vmem:[#allocation2 + $0x1] ss:$4 sm:$0xf] }
  0xd7   : > { %v655_v63 = vmax.f32 %v652_v61, %v654_v62  ;;  %v657_v0 = vld [vmem:[#allocation2 + $0x2] ss:$4 sm:$0xf]  ;;  %v660_v2 = vld [vmem:[#allocation2 + $0x3] ss:$4 sm:$0xf] }
  0xd9   : > { %v658_v1 = vmax.f32 %v655_v63, %v657_v0 }
  0xdb   : > { %v661_v3 = vmax.f32 %v658_v1, %v660_v2 }
  0xdd   : > { %662 = vst [vmem:[#allocation2] ss:$4 sm:$0xf] %v661_v3 }
  0xde   : > { %663 = vst [vmem:[#allocation2 + $0x1] ss:$4 sm:$0xf] %v661_v3 }
  0xdf   : > { %664 = vst [vmem:[#allocation2 + $0x2] ss:$4 sm:$0xf] %v661_v3 }
  0xe0   : > { %665 = vst [vmem:[#allocation2 + $0x3] ss:$4 sm:$0xf] %v661_v3 }
 0x13b   : > { %v575_v51 = vpop.f32.mrf.mxu1 }
 0x13e   : > { %v593_v12 = vpop.f32.mrf.mxu2 }
 0x13f   : > { %v597_v15 = vmul.f32 0.0625, %v593_v12 }
 0x141   : > { %v598_v20 = vperm.slane %v597_v15, 0 }
 0x142   : > { %v561_v17 = vpop.f32.mrf.mxu0 }
 0x143   : > { %v599_v24 = vmul.f32 %v598_v20, %v520_v16  ;;  %v600_v39 = vmul.f32 %v598_v20, %v522_v34 }
 0x145   : > { %601 = vadd.xlane.f32.xlu0 %v599_v24 }
 0x146   : > { %v595_v30 = vpop.f32.mrf.mxu2 }
 0x147   : > { %v242_v30 = vperm.slane %v1123_v10, 4 }
 0x149   : > { %v562_v37 = vadd.f32 %v561_v17, %v242_v30 }
 0x14a   : > { %v563_v34 = vpop.f32.mrf.mxu0 }
 0x14b   : > { %v564_v38 = vadd.f32 %v563_v34, %v242_v30  ;;  %v669_v42 = vrot.slane %v562_v37, 7 }
 0x14d   : > { %603 = vadd.xlane.f32.xlu0 %v600_v39  ;;  %v672_v39 = vshrl.u32 %v671_v35, 7 }
 0x14f   : > { %vm673_vm5 = vcmp.lt.s32.totalorder %v672_v39, 1  ;;  %vm677_vm6 = vcmp.lt.s32.totalorder %v672_v39, 7 }
 0x1b8   : > { %v602_v41 = vpop.xlane.xlu0 %601 }
 0x1c0   : > { %v604_v43 = vpop.xlane.xlu0 %603 }
 0x1c1   : > { %v605_v44 = vmax.f32 %v602_v41, %v604_v43 }
 0x1c3   : > { %v606_v45 = vrot.slane %v605_v44, 4 }
 0x1c5   : > { %v607_v46 = vmax.f32 %v605_v44, %v606_v45  ;;  %v676_v45 = vrot.slane %v564_v38, 1 }
 0x1c7   : > { %v608_v48 = vrot.slane %v607_v46, 2  ;;  %v678_v52 = vsel %vm677_vm6, %v676_v45, -inf }
 0x1c9   : > { %v609_v53 = vmax.f32 %v607_v46, %v608_v48  ;;  %v243_v46 = vperm.slane %v1123_v10, 5  ;;  %v576_v48 = vpop.f32.mrf.mxu1 }
 0x1cb   : > { %v610_v54 = vrot.slane %v609_v53, 1 }
 0x1cd   : > { %v611_v55 = vmax.f32 %v609_v53, %v610_v54  ;;  %v666_v53 = vld [vmem:[#allocation2 + $0x8] sm:$0xff]  ;;  %v577_v54 = vadd.f32 %v576_v48, %v243_v46 }
 0x1cf   : > { %v612_v56 = vsub.f32 %v602_v41, %v611_v55  ;;  %v613_v57 = vsub.f32 %v604_v43, %v611_v55  ;;  %v670_v43 = vrot.slane %v564_v38, 7 }
 0x1d1   : > { %v614_v58 = vmul.f32 1.442695, %v612_v56  ;;  %v616_v59 = vmul.f32 1.442695, %v613_v57  ;;  %v674_v44 = vsel %vm673_vm5, %v669_v42, %v670_v43 }
 0x1d2   : > { %v675_v49 = vmax.f32 %v564_v38, %v674_v44 }
 0x1d3   : > { %1021 = vpow2.f32 %v614_v58 }
 0x1d4   : > { %1023 = vpow2.f32 %v616_v59  ;;  %v679_v57 = vmax.f32 %v675_v49, %v678_v52 }
 0x1d9   : > { %v1022_v4 = vpop.eup %1021 }
 0x1da   : > { %v1024_v5 = vpop.eup %1023 }
 0x1db   : > { %v618_v6 = vadd.f32 %v1024_v5, %v1022_v4 }
 0x1dd   : > { %v619_v7 = vrot.slane %v618_v6, 4 }
 0x1df   : > { %v620_v8 = vadd.f32 %v619_v7, %v618_v6 }
 0x1e1   : > { %v621_v9 = vrot.slane %v620_v8, 2 }
 0x1e3   : > { %v622_v11 = vadd.f32 %v621_v9, %v620_v8 }
 0x1e5   : > { %v623_v12 = vrot.slane %v622_v11, 1 }
 0x1e7   : > { %v624_v13 = vadd.f32 %v623_v12, %v622_v11 }
 0x1e9   : > { %1025 = vrcp.f32 %v624_v13  ;;  %v636_v18 = vand.u32 2147483648, %v624_v13  ;;  %v634_v20 = vand.u32 2147483647, %v624_v13  ;;  %vm630_vm2 = vweird.f32 %v624_v13 }
 0x1eb   : > { %v637_v23 = vor.u32 1.1754944e-38, %v636_v18  ;;  %vm635_vm4 = vcmp.eq.f32.partialorder %v634_v20, 8.507059e+37 }
 0x1ef   : > { %v1026_v14 = vpop.eup %1025 }
 0x1f0   : > { %v626_v15 = vmul.f32 %v1026_v14, %v624_v13  ;;  %vm631_vm1 = vweird.f32 %v1026_v14 }
 0x1f1   : > { %vm632_vm3 = vmor %vm630_vm2, %vm631_vm1 }
 0x1f2   : > { %v627_v16 = vsub.f32 1.0, %v626_v15 }
 0x1f4   : > { %v628_v19 = vmul.f32 %v1026_v14, %v627_v16 }
 0x1f6   : > { %v629_v22 = vadd.f32 %v1026_v14, %v628_v19 }
 0x1f8   : > { %v633_v24 = vsel %vm632_vm3, %v1026_v14, %v629_v22 }
 0x1f9   : > { %v638_v25 = vsel %vm635_vm4, %v637_v23, %v633_v24 }
 0x1fa   : > { %v639_v28 = vmul.f32 %v1022_v4, %v638_v25  ;;  %v640_v29 = vmul.f32 %v1024_v5, %v638_v25 }
 0x1fc   : > { %v641_v31 = vmul.f32 %v639_v28, %v534_v26  ;;  %v642_v33 = vmul.f32 %v640_v29, %v536_v27 }
 0x1fe   : > { %v643_v36 = vadd.f32 %v642_v33, %v641_v31 }
 0x200   : > { %v644_v40 = vrot.slane %v643_v36, 4 }
 0x202   : > { %v645_v41 = vadd.f32 %v644_v40, %v643_v36 }
 0x204   : > { %v646_v32 = vrot.slane %v645_v41, 2 }
 0x206   : > { %v647_v60 = vadd.f32 %v646_v32, %v645_v41 }
 0x208   : > { %v648_v47 = vrot.slane %v647_v60, 1 }
 0x20a   : > { %v649_v50 = vadd.f32 %v648_v47, %v647_v60 }
 0x20c   : > { %v667_v55 = vadd.f32 %v666_v53, %v649_v50 }
 0x20e   : > { %v668_v56 = vmul.f32 %v667_v55, %v577_v54 }
 0x210   : > { %v680_v51 = vadd.f32 %v679_v57, %v668_v56 }
 0x212   : > { %681 = vst [vmem:[%s183_s29 - $0x7] sm:$0x80] %v680_v51 }
 0x213 PF: > { %s14_s12 = sadd.s32 1, %s1067_s12  }
 0x214   : > { %p11_p7 = scmp.ge.s32.totalorder %s14_s12, 4  }
 0x216   :  { %13 = sbr.rel (!%p11_p7) target bundleno = 1 (0x1), region = 70 }
 0x21b   :  { %699 = vsyncpa [#allocation4], 1 }
 0x21c   :  { %701 = vsyncpa [#allocation4 + $0x1], 1 }

// kernel: ponet_forward.3
= control target key start
LH: loop header
LB: loop body
LE: loop exit
PB: predicated region body
PF: predicated region fallthrough
CT: control target
= control target key end

     0   :  { %10 = vsyncpa [#allocation4], 0  ;;  %s1619_s0 = inlined_call_operand.hbm [shape: f32[2,16,16], index: 0, kind: input, shape index: {}]   ;;  %s1620_s1 = inlined_call_operand.vmem [shape: bf16[16,128], index: 1, kind: input, shape index: {}]   ;;  %s1621_s2 = inlined_call_operand.hbm [shape: f32[1,128], index: 2, kind: input, shape index: {}]   ;;  %s1622_s3 = inlined_call_operand.hbm [shape: bf16[128,768], index: 3, kind: input, shape index: {}]   ;;  %s1623_s4 = inlined_call_operand.hbm [shape: f32[1,768], index: 4, kind: input, shape index: {}]   ;;  %s1624_s5 = inlined_call_operand.vmem [shape: bf16[2,16,128], index: 5, kind: output, shape index: {}]  }
   0x1   :  { %12 = vsyncpa [#allocation4 + $0x1], 0 }
   0x2   :  { %13 = vsyncpa [#allocation6], 0 }
   0x3   :  { %14 = vsyncpa [#allocation9], 0  ;;  %s1481_s18 = smov 0   ;;  %s1483_s19 = smov 0  }
   0x4   :  { %s1485_s20 = smov 0   ;;  %s1487_s21 = smov 0  }
   0x5 LB: > { %s1500_s22 = sadd.s32 4294967295, %s1441_s21   ;;  %p40_p0 = scmp.ne.s32.totalorder %s1433_s19, %s1429_s18  ;;  %s1441_s21 = sphi %s1487_s21, %s1633_s21   ;;  %s1437_s20 = sphi %s1485_s20, %s1632_s20   ;;  %s1433_s19 = sphi %s1483_s19, %s1631_s19   ;;  %s1429_s18 = sphi %s1481_s18, %s1630_s18  }
   0x6   : > { %p41_p1 = scmp.eq.s32.totalorder %s1500_s22, 0  ;;  %p926_p2 = scmp.ge.s32.totalorder %s1441_s21, 1 }
   0x7   : > { %p161_p3 = scmp.lt.s32.totalorder %s1441_s21, 3  ;;  %s176_s26 = sshll.u32 %s1621_s2, 4  ;;  %s177_s26 = int_to_ptr.hbm [resolvable:$true] %s176_s26 }
   0x8   : > { %p1508_p4 = por %p41_p1, %p40_p0  ;;  %s1443_s28 = smov [#allocation5]  }
   0x9   : > { %p1515_p5 = pnand %p926_p2, %p161_p3  ;;  %s178_s29 = sshll.u32 %s1443_s28, 4  ;;  %s179_s29 = int_to_ptr.vmem [resolvable:$true] %s178_s29 }
   0xa   : > { %s187_s7 = sshll.u32 %s1622_s3, 4  ;;  %s1444_s9 = smov [#allocation7]   ;;  %s188_s7 = int_to_ptr.hbm [resolvable:$true] %s187_s7 }
   0xb   : > { %p1211_p6 = pneg %p1515_p5  ;;  %s189_s10 = sshll.u32 %s1444_s9, 4  ;;  %s190_s10 = int_to_ptr.vmem [resolvable:$true] %s189_s10 }
   0xc   : > { %s1445_s11 = smov 384   ;;  %s1446_s12 = smov 24  }
   0xd   : > { %p1526_p7 = pnand %p1211_p6, %p41_p1  ;;  %s202_s15 = sshll.u32 %s1623_s4, 4  ;;  %s203_s15 = int_to_ptr.hbm [resolvable:$true] %s202_s15 }
   0xe   : > { %s1447_s16 = smov [#allocation8]   ;;  %s1540_s18 = sadd.s32 1, %s1441_s21  }
   0xf   : > { %1214 = dma.hbm_to_vmem [thread:$0]  (!%p1526_p7), %s177_s26, 16, %s179_s29, [#allocation6]  }
  0x10   : > { %1217 = dma.hbm_to_vmem [thread:$0]  (!%p1526_p7), %s188_s7, 6144, %s190_s10, [#allocation6], %s1445_s11, %s1445_s11, %s1446_s12  }
  0x11   : > { %s204_s17 = sshll.u32 %s1447_s16, 4  ;;  %s24_s24 = ssub.s32 %s1441_s21, %s1540_s18  ;;  %s205_s17 = int_to_ptr.vmem [resolvable:$true] %s204_s17 }
  0x12   : > { %1220 = dma.hbm_to_vmem [thread:$0]  (!%p1526_p7), %s203_s15, 96, %s205_s17, [#allocation9]  }
  0x13   : > { %s27_s25 = sadd.s32 1, %s1437_s20  ;;  %p25_p8 = scmp.eq.s32.totalorder %s24_s24, 0 }
  0x14   : > { %p34_p9 = scmp.ne.s32.totalorder %s1437_s20, %s1433_s19  ;;  %p35_p10 = scmp.eq.s32.totalorder %s1441_s21, 0 }
  0x15   : > { %p1228_p11 = scmp.lt.s32.totalorder %s1441_s21, 2  ;;  %s215_s28 = sand.u32 1, %s1437_s20  }
  0x16   : > { %s1550_s26 = scalar_select %p25_p8, %s1437_s20, %s27_s25  }
  0x17   : > { %p36_p12 = por %p35_p10, %p34_p9  ;;  %s931_s29 = sshll.u32 %s215_s28, 4 }
  0x18   : > { %s1141_s30 = sshll.u32 %s1441_s21, 4  ;;  %s219_s9 = scalar_lea.vmem [#allocation3], %s931_s29 }
  0x19   : > { %s224_s8 = scalar_lea.hbm %s1619_s0, %s1141_s30  ;;  %s227_s10 = sshll.u32 %s219_s9, 4  ;;  %s228_s10 = int_to_ptr.vmem [resolvable:$true] %s227_s10 }
  0x1a   : > { %s225_s11 = sshll.u32 %s224_s8, 4  ;;  %p1557_p13 = pnand %p1228_p11, %p36_p12  ;;  %s226_s11 = int_to_ptr.hbm [resolvable:$true] %s225_s11 }
  0x1b   : > { %s216_s13 = scalar_lea.sflag [#allocation4], %s215_s28  ;;  %s1369_s14 = sshra.s32 %s226_s11, 4  ;;  %s1370_s14 = int_to_ptr.hbm [resolvable:$true] %s1369_s14 }
  0x1c   : > { %s1371_s15 = scalar_lea.hbm %s1370_s14, 16  ;;  %p1373_p2 = pneg %p1557_p13 }
  0x1d   : > { %p1372_p0 = scmp.ne.s32.totalorder %s1370_s14, %s1371_s15  ;;  %s1376_s17 = scalar_lea.hbm %s1619_s0, 32 }
  0x1e   : > { %p1377_p7 = scmp.lt.s32.totalorder %s1370_s14, %s1619_s0  ;;  %p1378_p8 = scmp.lt.s32.totalorder %s1376_s17, %s1371_s15 }
  0x1f   : > { %p1374_p3 = pnand %p1373_p2, %p1372_p0 }
  0x20   : > { %p1379_p9 = por %p1378_p8, %p1377_p7 }
  0x21   : > { %p1375_p6 = pneg %p1374_p3 }
  0x23   : > { %p1380_p10 = pnand %p1379_p9, %p1375_p6 }
  0x25   : > { %1383 = shalt.err (!%p1380_p10)
}
  0x26   : > { %s1448_s28 = smov 128   ;;  %s1449_s29 = smov 8  }
  0x27   : > { %1224 = dma.hbm_to_vmem [thread:$0]  (!%p1557_p13), %s226_s11, 256, %s228_s10, %s216_s13, %s1448_s28, %s1448_s28, %s1449_s29  }
  0x28   : > { %239 = sbr.rel (%p1515_p5) target bundleno = 679 (0x2a7), region = 40  ;;  %s241_s30 = sand.u32 (!%p1515_p5), 1, %s1433_s19  }
  0x29   : > { %s935_s6 = sshll.u32 (!%p1515_p5), %s241_s30, 4  ;;  %s242_s7 = scalar_lea.sflag (!%p1515_p5), [#allocation4], %s241_s30 }
  0x2a   : > { %s245_s8 = scalar_lea.vmem (!%p1515_p5), [#allocation3], %s935_s6 }
  0x2d   : > { %1416 = dma.done.wait (%p1508_p4), %s242_s7, 256  }
  0x2e   : > { %1418 = vsyncadd (%p1508_p4), %s242_s7, 4294967040 }
  0x2f   : > { %1420 = dma.done.wait (%p41_p1), [#allocation6], 6160  }
  0x30   : > { %1422 = vsyncadd (%p41_p1), [#allocation6], 4294961136 }
  0x31   : > { %1424 = dma.done.wait (%p41_p1), [#allocation9], 96  }
  0x32   : > { %1426 = vsyncadd (%p41_p1), [#allocation9], 4294967200  ;;  %v1143_v0 = vld [vmem:[%s1620_s1] sm:$0xff]  ;;  %v296_v2 = vld [vmem:[%s245_s8 + $0x8] sm:$0xff]  ;;  %vm310_vm0 = vcmask 130048   ;;  %p288_p1 = scmp.lt.s32.totalorder %s1500_s22, 1 }
  0x33   : > { %v295_v1 = vld [vmem:[%s245_s8] sm:$0xff]  ;;  %v1189_v5 = vld [vmem:[#allocation7 + $0x164] sm:$0xf0]  ;;  %321 = vmatpush.bf16.msra.mxu0 %v1143_v0  ;;  %v1183_v10 = vld [vmem:[#allocation7 + $0x134] sm:$0xf0] }
  0x34   : > { %v297_v3 = vpack.c.bf16 %v296_v2, %v295_v1  ;;  %v1116_v4 = vld [vmem:[#allocation7 + $0x150] sm:$0xf]  ;;  %v1186_v6 = vld [vmem:[#allocation7 + $0x154] sm:$0xf]  ;;  %v1118_v8 = vld [vmem:[#allocation7 + $0x168] sm:$0xf0] }
  0x35   : > { %v1117_v7 = vor.u32 %v1189_v5, %v1116_v4  ;;  %v1092_v9 = vld [vmem:[#allocation7 + $0x120] sm:$0xf]  ;;  %v1121_v11 = vor.u32 %v1186_v6, %v1118_v8  ;;  %v1180_v12 = vld [vmem:[#allocation7 + $0x124] sm:$0xf]  ;;  %v1094_v13 = vld [vmem:[#allocation7 + $0x138] sm:$0xf0] }
  0x36   : > { %v1093_v14 = vor.u32 %v1183_v10, %v1092_v9  ;;  %945 = vmatmul.msk.bf16.vlgmr.msra.gmra.mxu0 %vm310_vm0, %v297_v3  ;;  %v1097_v15 = vor.u32 %v1180_v12, %v1094_v13  ;;  %v1068_v16 = vld [vmem:[#allocation7 + $0xf0] sm:$0xf]  ;;  %v1177_v17 = vld [vmem:[#allocation7 + $0x104] sm:$0xf0]  ;;  %v1174_v18 = vld [vmem:[#allocation7 + $0xf4] sm:$0xf] }
  0x37   : > { %631 = vmatpush.bf16.msra.mxu1 %v1117_v7  ;;  %645 = vmatpush.bf16.msra.mxu2 %v1121_v11  ;;  %v1070_v19 = vld [vmem:[#allocation7 + $0x108] sm:$0xf0]  ;;  %v1124_v20 = vld [vmem:[#allocation7 + $0x158] sm:$0xf]  ;;  %v1190_v21 = vld [vmem:[#allocation7 + $0x16c] sm:$0xf0]  ;;  %v1069_v25 = vor.u32 %v1177_v17, %v1068_v16 }
  0x38   : > { %v1125_v22 = vor.u32 %v1190_v21, %v1124_v20  ;;  %v1187_v23 = vld [vmem:[#allocation7 + $0x15c] sm:$0xf]  ;;  %v1126_v24 = vld [vmem:[#allocation7 + $0x170] sm:$0xf0]  ;;  %v1044_v26 = vld [vmem:[#allocation7 + $0xc0] sm:$0xf]  ;;  %v1073_v29 = vor.u32 %v1174_v18, %v1070_v19 }
  0x39   : > { %v1171_v27 = vld [vmem:[#allocation7 + $0xd4] sm:$0xf0]  ;;  %v1129_v28 = vor.u32 %v1187_v23, %v1126_v24  ;;  %v1100_v30 = vld [vmem:[#allocation7 + $0x128] sm:$0xf]  ;;  %v1184_v31 = vld [vmem:[#allocation7 + $0x13c] sm:$0xf0] }
  0x3a   : > { %659 = vmatpush.bf16.msra.mxu3 %v1125_v22  ;;  %v1181_v32 = vld [vmem:[#allocation7 + $0x12c] sm:$0xf]  ;;  %v1168_v33 = vld [vmem:[#allocation7 + $0xc4] sm:$0xf]  ;;  %v1046_v34 = vld [vmem:[#allocation7 + $0xd8] sm:$0xf0]  ;;  %v1101_v35 = vor.u32 %v1184_v31, %v1100_v30  ;;  %v1045_v39 = vor.u32 %v1171_v27, %v1044_v26 }
  0x3b   : > { %632 = vmatpush.bf16.msra.mxu1 %v1093_v14  ;;  %646 = vmatpush.bf16.msra.mxu2 %v1097_v15  ;;  %v1102_v36 = vld [vmem:[#allocation7 + $0x140] sm:$0xf0]  ;;  %v1076_v38 = vld [vmem:[#allocation7 + $0xf8] sm:$0xf]  ;;  %v1178_v40 = vld [vmem:[#allocation7 + $0x10c] sm:$0xf0]  ;;  %v1049_v43 = vor.u32 %v1168_v33, %v1046_v34 }
  0x3c   : > { %673 = vmatpush.bf16.msrb.mxu0 %v1129_v28  ;;  %v1105_v37 = vor.u32 %v1181_v32, %v1102_v36  ;;  %v1175_v41 = vld [vmem:[#allocation7 + $0xfc] sm:$0xf]  ;;  %v1078_v42 = vld [vmem:[#allocation7 + $0x110] sm:$0xf0]  ;;  %v1020_v44 = vld [vmem:[#allocation7 + $0x90] sm:$0xf]  ;;  %v1077_v47 = vor.u32 %v1178_v40, %v1076_v38 }
  0x3d   : > { %v1165_v45 = vld [vmem:[#allocation7 + $0xa4] sm:$0xf0]  ;;  %v1162_v46 = vld [vmem:[#allocation7 + $0x94] sm:$0xf]  ;;  %v1022_v48 = vld [vmem:[#allocation7 + $0xa8] sm:$0xf0]  ;;  %v1081_v49 = vor.u32 %v1175_v41, %v1078_v42 }
  0x3e   : > { %660 = vmatpush.bf16.msra.mxu3 %v1101_v35  ;;  %v1052_v50 = vld [vmem:[#allocation7 + $0xc8] sm:$0xf]  ;;  %v1172_v51 = vld [vmem:[#allocation7 + $0xdc] sm:$0xf0]  ;;  %v1169_v52 = vld [vmem:[#allocation7 + $0xcc] sm:$0xf]  ;;  %v1021_v54 = vor.u32 %v1165_v45, %v1020_v44  ;;  %v1025_v55 = vor.u32 %v1162_v46, %v1022_v48 }
  0x3f   : > { %633 = vmatpush.bf16.msra.mxu1 %v1069_v25  ;;  %647 = vmatpush.bf16.msra.mxu2 %v1073_v29  ;;  %v1054_v53 = vld [vmem:[#allocation7 + $0xe0] sm:$0xf0]  ;;  %v996_v56 = vld [vmem:[#allocation7 + $0x60] sm:$0xf]  ;;  %v1159_v57 = vld [vmem:[#allocation7 + $0x74] sm:$0xf0]  ;;  %v1053_v59 = vor.u32 %v1172_v51, %v1052_v50 }
  0x40   : > { %674 = vmatpush.bf16.msrb.mxu0 %v1105_v37  ;;  %v1156_v58 = vld [vmem:[#allocation7 + $0x64] sm:$0xf]  ;;  %v998_v60 = vld [vmem:[#allocation7 + $0x78] sm:$0xf0]  ;;  %v1057_v61 = vor.u32 %v1169_v52, %v1054_v53  ;;  %v1028_v62 = vld [vmem:[#allocation7 + $0x98] sm:$0xf]  ;;  %v997_v2 = vor.u32 %v1159_v57, %v996_v56 }
  0x41   : > { %v1166_v63 = vld [vmem:[#allocation7 + $0xac] sm:$0xf0]  ;;  %v1163_v0 = vld [vmem:[#allocation7 + $0x9c] sm:$0xf]  ;;  %v1030_v1 = vld [vmem:[#allocation7 + $0xb0] sm:$0xf0]  ;;  %v1001_v3 = vor.u32 %v1156_v58, %v998_v60 }
  0x42   : > { %661 = vmatpush.bf16.msra.mxu3 %v1077_v47  ;;  %v972_v4 = vld [vmem:[#allocation7 + $0x30] sm:$0xf]  ;;  %v1153_v5 = vld [vmem:[#allocation7 + $0x44] sm:$0xf0]  ;;  %v1029_v6 = vor.u32 %v1166_v63, %v1028_v62  ;;  %v1150_v7 = vld [vmem:[#allocation7 + $0x34] sm:$0xf]  ;;  %v1033_v9 = vor.u32 %v1163_v0, %v1030_v1 }
  0x43   : > { %634 = vmatpush.bf16.msra.mxu1 %v1045_v39  ;;  %648 = vmatpush.bf16.msra.mxu2 %v1049_v43  ;;  %v974_v8 = vld [vmem:[#allocation7 + $0x48] sm:$0xf0]  ;;  %v973_v10 = vor.u32 %v1153_v5, %v972_v4  ;;  %v948_v12 = vld [vmem:[#allocation7] sm:$0xf]  ;;  %v1147_v13 = vld [vmem:[#allocation7 + $0x14] sm:$0xf0] }
  0x44   : > { %675 = vmatpush.bf16.msrb.mxu0 %v1081_v49  ;;  %v977_v11 = vor.u32 %v1150_v7, %v974_v8  ;;  %v1144_v14 = vld [vmem:[#allocation7 + $0x4] sm:$0xf]  ;;  %v950_v15 = vld [vmem:[#allocation7 + $0x18] sm:$0xf0]  ;;  %v1132_v16 = vld [vmem:[#allocation7 + $0x160] sm:$0xf]  ;;  %v949_v20 = vor.u32 %v1147_v13, %v948_v12 }
  0x45   : > { %v1191_v17 = vld [vmem:[#allocation7 + $0x174] sm:$0xf0]  ;;  %v1188_v18 = vld [vmem:[#allocation7 + $0x164] sm:$0xf]  ;;  %v1134_v19 = vld [vmem:[#allocation7 + $0x178] sm:$0xf0]  ;;  %v953_v21 = vor.u32 %v1144_v14, %v950_v15 }
  0x46   : > { %662 = vmatpush.bf16.msra.mxu3 %v1053_v59  ;;  %v1133_v22 = vor.u32 %v1191_v17, %v1132_v16  ;;  %v1137_v23 = vor.u32 %v1188_v18, %v1134_v19  ;;  %v1004_v24 = vld [vmem:[#allocation7 + $0x68] sm:$0xf]  ;;  %v1160_v25 = vld [vmem:[#allocation7 + $0x7c] sm:$0xf0]  ;;  %v1157_v26 = vld [vmem:[#allocation7 + $0x6c] sm:$0xf] }
  0x47   : > { %635 = vmatpush.bf16.msra.mxu1 %v1021_v54  ;;  %649 = vmatpush.bf16.msra.mxu2 %v1025_v55  ;;  %v1005_v27 = vor.u32 %v1160_v25, %v1004_v24  ;;  %v1006_v28 = vld [vmem:[#allocation7 + $0x80] sm:$0xf0]  ;;  %v1108_v29 = vld [vmem:[#allocation7 + $0x130] sm:$0xf]  ;;  %v1185_v30 = vld [vmem:[#allocation7 + $0x144] sm:$0xf0] }
  0x48   : > { %676 = vmatpush.bf16.msrb.mxu0 %v1057_v61  ;;  %v1009_v31 = vor.u32 %v1157_v26, %v1006_v28  ;;  %v1109_v32 = vor.u32 %v1185_v30, %v1108_v29  ;;  %v1182_v33 = vld [vmem:[#allocation7 + $0x134] sm:$0xf]  ;;  %v1110_v34 = vld [vmem:[#allocation7 + $0x148] sm:$0xf0]  ;;  %v980_v35 = vld [vmem:[#allocation7 + $0x38] sm:$0xf] }
  0x49   : > { %v1113_v36 = vor.u32 %v1182_v33, %v1110_v34  ;;  %v1154_v37 = vld [vmem:[#allocation7 + $0x4c] sm:$0xf0]  ;;  %v1151_v38 = vld [vmem:[#allocation7 + $0x3c] sm:$0xf]  ;;  %v982_v39 = vld [vmem:[#allocation7 + $0x50] sm:$0xf0] }
  0x4a   : > { %663 = vmatpush.bf16.msra.mxu3 %v1029_v6  ;;  %v981_v40 = vor.u32 %v1154_v37, %v980_v35  ;;  %v985_v41 = vor.u32 %v1151_v38, %v982_v39  ;;  %v1084_v42 = vld [vmem:[#allocation7 + $0x100] sm:$0xf]  ;;  %v1179_v43 = vld [vmem:[#allocation7 + $0x114] sm:$0xf0]  ;;  %v1176_v44 = vld [vmem:[#allocation7 + $0x104] sm:$0xf] }
  0x4b   : > { %636 = vmatpush.bf16.msra.mxu1 %v997_v2  ;;  %650 = vmatpush.bf16.msra.mxu2 %v1001_v3  ;;  %v1085_v45 = vor.u32 %v1179_v43, %v1084_v42  ;;  %v1086_v46 = vld [vmem:[#allocation7 + $0x118] sm:$0xf0]  ;;  %v956_v48 = vld [vmem:[#allocation7 + $0x8] sm:$0xf]  ;;  %v1148_v49 = vld [vmem:[#allocation7 + $0x1c] sm:$0xf0] }
  0x4c   : > { %677 = vmatpush.bf16.msrb.mxu0 %v1033_v9  ;;  %v1089_v47 = vor.u32 %v1176_v44, %v1086_v46  ;;  %v1145_v50 = vld [vmem:[#allocation7 + $0xc] sm:$0xf]  ;;  %v957_v51 = vor.u32 %v1148_v49, %v956_v48  ;;  %v958_v52 = vld [vmem:[#allocation7 + $0x20] sm:$0xf0]  ;;  %v1060_v53 = vld [vmem:[#allocation7 + $0xd0] sm:$0xf] }
  0x4d   : > { %v1173_v54 = vld [vmem:[#allocation7 + $0xe4] sm:$0xf0]  ;;  %v961_v55 = vor.u32 %v1145_v50, %v958_v52  ;;  %v1170_v57 = vld [vmem:[#allocation7 + $0xd4] sm:$0xf]  ;;  %v1062_v58 = vld [vmem:[#allocation7 + $0xe8] sm:$0xf0] }
  0x4e   : > { %664 = vmatpush.bf16.msra.mxu3 %v1005_v27  ;;  %v1061_v56 = vor.u32 %v1173_v54, %v1060_v53  ;;  %v1065_v59 = vor.u32 %v1170_v57, %v1062_v58  ;;  %v1036_v60 = vld [vmem:[#allocation7 + $0xa0] sm:$0xf]  ;;  %v1167_v61 = vld [vmem:[#allocation7 + $0xb4] sm:$0xf0]  ;;  %v1164_v62 = vld [vmem:[#allocation7 + $0xa4] sm:$0xf] }
  0x4f   : > { %637 = vmatpush.bf16.msra.mxu1 %v973_v10  ;;  %651 = vmatpush.bf16.msra.mxu2 %v977_v11  ;;  %v1037_v63 = vor.u32 %v1167_v61, %v1036_v60  ;;  %v1038_v0 = vld [vmem:[#allocation7 + $0xb8] sm:$0xf0]  ;;  %v1012_v2 = vld [vmem:[#allocation7 + $0x70] sm:$0xf]  ;;  %v1161_v3 = vld [vmem:[#allocation7 + $0x84] sm:$0xf0] }
  0x50   : > { %678 = vmatpush.bf16.msrb.mxu0 %v1009_v31  ;;  %v1041_v1 = vor.u32 %v1164_v62, %v1038_v0  ;;  %v1158_v4 = vld [vmem:[#allocation7 + $0x74] sm:$0xf]  ;;  %v1013_v5 = vor.u32 %v1161_v3, %v1012_v2  ;;  %v1014_v6 = vld [vmem:[#allocation7 + $0x88] sm:$0xf0]  ;;  %v988_v8 = vld [vmem:[#allocation7 + $0x40] sm:$0xf] }
  0x51   : > { %v1017_v7 = vor.u32 %v1158_v4, %v1014_v6  ;;  %v1155_v9 = vld [vmem:[#allocation7 + $0x54] sm:$0xf0]  ;;  %v1152_v10 = vld [vmem:[#allocation7 + $0x44] sm:$0xf]  ;;  %v990_v11 = vld [vmem:[#allocation7 + $0x58] sm:$0xf0] }
  0x52   : > { %665 = vmatpush.bf16.msra.mxu3 %v981_v40  ;;  %v989_v12 = vor.u32 %v1155_v9, %v988_v8  ;;  %v993_v13 = vor.u32 %v1152_v10, %v990_v11  ;;  %v964_v14 = vld [vmem:[#allocation7 + $0x10] sm:$0xf]  ;;  %v1149_v15 = vld [vmem:[#allocation7 + $0x24] sm:$0xf0]  ;;  %v1146_v16 = vld [vmem:[#allocation7 + $0x14] sm:$0xf] }
  0x53   : > { %638 = vmatpush.bf16.msra.mxu1 %v949_v20  ;;  %652 = vmatpush.bf16.msra.mxu2 %v953_v21  ;;  %v966_v17 = vld [vmem:[#allocation7 + $0x28] sm:$0xf0]  ;;  %v965_v18 = vor.u32 %v1149_v15, %v964_v14  ;;  %v1272_v21 = vld [vmem:[#allocation5] ss:$0 sm:$0xff]  ;;  %v1590_v26 = vld [vmem:[#allocation8] sm:$0x3f] }
  0x54   : > { %679 = vmatpush.bf16.msrb.mxu0 %v985_v41  ;;  %v969_v19 = vor.u32 %v1146_v16, %v966_v17  ;;  %v382_v27 = vperm.slane %v1590_v26, 3  ;;  %v379_v31 = vperm.slane %v1590_v26, 0  ;;  %v1450_v38 = vmov 1065369472   ;;  %s1635_s22 = smov (!%p288_p1, %s1500_s22), 1 }
  0x55   : > { %v380_v49 = vperm.slane %v1590_v26, 1  ;;  %s1142_s23 = sshll.u32 %s1635_s22, 3 }
  0x56   : > { %666 = vmatpush.bf16.msra.mxu3 %v957_v51  ;;  %s292_s12 = scalar_lea.vmem %s1624_s5, %s1142_s23 }
  0x57   : > { %687 = vmatpush.bf16.msrb.mxu1 %v1133_v22  ;;  %701 = vmatpush.bf16.msrb.mxu2 %v1137_v23 }
  0x58   : > { %680 = vmatpush.bf16.msrb.mxu0 %v961_v55 }
  0x5b   : > { %688 = vmatpush.bf16.msrb.mxu1 %v1109_v32  ;;  %702 = vmatpush.bf16.msrb.mxu2 %v1113_v36 }
  0x5f   : > { %689 = vmatpush.bf16.msrb.mxu1 %v1085_v45  ;;  %703 = vmatpush.bf16.msrb.mxu2 %v1089_v47 }
  0x63   : > { %690 = vmatpush.bf16.msrb.mxu1 %v1061_v56  ;;  %704 = vmatpush.bf16.msrb.mxu2 %v1065_v59 }
  0x67   : > { %691 = vmatpush.bf16.msrb.mxu1 %v1037_v63  ;;  %705 = vmatpush.bf16.msrb.mxu2 %v1041_v1 }
  0x6b   : > { %692 = vmatpush.bf16.msrb.mxu1 %v1013_v5  ;;  %706 = vmatpush.bf16.msrb.mxu2 %v1017_v7 }
  0x6f   : > { %693 = vmatpush.bf16.msrb.mxu1 %v989_v12  ;;  %707 = vmatpush.bf16.msrb.mxu2 %v993_v13 }
  0x73   : > { %694 = vmatpush.bf16.msrb.mxu1 %v965_v18  ;;  %708 = vmatpush.bf16.msrb.mxu2 %v969_v19 }
  0xb3   : > { %v323_v20 = vpop.f32.mrf.mxu0 }
  0xb4   : > { %v324_v23 = vadd.f32 %v1272_v21, %v323_v20 }
  0xbb   : > { %v325_v22 = vpop.f32.mrf.mxu0 }
  0xbc   : > { %v326_v24 = vadd.f32 %v1272_v21, %v325_v22 }
  0xbe   : > { %v328_v25 = vpack.c.bf16 %v326_v24, %v324_v23  ;;  %v381_v24 = vperm.slane %v1590_v26, 2 }
  0xc0   : > { %639 = vmatmul.bf16.vlgmr.msra.gmra.mxu1 %v328_v25  ;;  %653 = vmatmul.bf16.vlgmr.msra.gmra.mxu2 %v328_v25 }
  0xc1   : > { %667 = vmatmul.bf16.vlgmr.msra.gmra.mxu3 %v328_v25  ;;  %681 = vmatmul.bf16.vlgmr.msrb.gmra.mxu0 %v328_v25 }
  0xd0   : > { %695 = vmatmul.bf16.vlgmr.msrb.gmra.mxu1 %v328_v25  ;;  %709 = vmatmul.bf16.vlgmr.msrb.gmra.mxu2 %v328_v25 }
 0x13d   : > { %v640_v28 = vpop.f32.mrf.mxu1 }
 0x13e   : > { %v682_v29 = vpop.f32.mrf.mxu0  ;;  %v641_v33 = vadd.f32 %v640_v28, %v379_v31 }
 0x13f   : > { %v683_v30 = vadd.f32 %v682_v29, %v382_v27 }
 0x141   : > { %785 = vst [vmem:[#allocation2] sm:$0xff] %v683_v30 }
 0x143   : > { %v654_v48 = vpop.f32.mrf.mxu2 }
 0x144   : > { %v668_v46 = vpop.f32.mrf.mxu3  ;;  %v655_v52 = vadd.f32 %v654_v48, %v380_v49 }
 0x145   : > { %v642_v32 = vpop.f32.mrf.mxu1  ;;  %v669_v30 = vadd.f32 %v668_v46, %v381_v24 }
 0x146   : > { %v643_v34 = vadd.f32 %v642_v32, %v379_v31  ;;  %v684_v35 = vpop.f32.mrf.mxu0 }
 0x147   : > { %v685_v36 = vadd.f32 %v684_v35, %v382_v27 }
 0x148   : > { %v715_v37 = vpack.c.bf16 %v643_v34, %v641_v33 }
 0x149   : > { %786 = vst [vmem:[#allocation2 + $0x8] sm:$0xff] %v685_v36 }
 0x14a   : > { %726 = vmatpush.bf16.msrb.mxu3 %v715_v37  ;;  %v383_v37 = vperm.slane %v1590_v26, 4 }
 0x14b   : > { %v656_v55 = vpop.f32.mrf.mxu2 }
 0x14c   : > { %v670_v47 = vpop.f32.mrf.mxu3  ;;  %v657_v57 = vadd.f32 %v656_v55, %v380_v49 }
 0x14d   : > { %1138 = vmatmul.msk.bf16.vlgmr.msrb.gmra.mxu3 %vm310_vm0, %v1450_v38  ;;  %v696_v19 = vpop.f32.mrf.mxu1  ;;  %v671_v31 = vadd.f32 %v670_v47, %v381_v24  ;;  %v809_v38 = vlaneseq }
 0x150   : > { %v787_v39 = vld [vmem:[#allocation2] ss:$4 sm:$0xf]  ;;  %v789_v40 = vld [vmem:[#allocation2 + $0x1] ss:$4 sm:$0xf] }
 0x151   : > { %v790_v41 = vmax.f32 %v787_v39, %v789_v40  ;;  %v792_v42 = vld [vmem:[#allocation2 + $0x2] ss:$4 sm:$0xf]  ;;  %v795_v44 = vld [vmem:[#allocation2 + $0x3] ss:$4 sm:$0xf] }
 0x153   : > { %v793_v43 = vmax.f32 %v790_v41, %v792_v42  ;;  %v710_v40 = vpop.f32.mrf.mxu2 }
 0x155   : > { %v796_v45 = vmax.f32 %v793_v43, %v795_v44  ;;  %v698_v34 = vpop.f32.mrf.mxu1  ;;  %v697_v43 = vadd.f32 %v696_v19, %v383_v37  ;;  %v810_v44 = vshrl.u32 %v809_v38, 7 }
 0x156   : > { %v699_v41 = vadd.f32 %v698_v34, %v383_v37 }
 0x157   : > { %797 = vst [vmem:[#allocation2] ss:$4 sm:$0xf] %v796_v45  ;;  %v807_v47 = vrot.slane %v697_v43, 7  ;;  %vm811_vm5 = vcmp.lt.s32.totalorder %v810_v44, 1  ;;  %vm818_vm6 = vcmp.lt.s32.totalorder %v810_v44, 7 }
 0x158   : > { %798 = vst [vmem:[#allocation2 + $0x1] ss:$4 sm:$0xf] %v796_v45  ;;  %v808_v48 = vrot.slane %v699_v41, 7  ;;  %v816_v55 = vrot.slane %v697_v43, 1 }
 0x159   : > { %799 = vst [vmem:[#allocation2 + $0x2] ss:$4 sm:$0xf] %v796_v45 }
 0x15a   : > { %800 = vst [vmem:[#allocation2 + $0x3] ss:$4 sm:$0xf] %v796_v45 }
 0x1d0   : > { %v728_v50 = vpop.f32.mrf.mxu3 }
 0x1d1   : > { %v732_v51 = vmul.f32 0.0625, %v728_v50  ;;  %v384_v50 = vperm.slane %v1590_v26, 5 }
 0x1d3   : > { %v733_v53 = vperm.slane %v732_v51, 0  ;;  %v812_v51 = vsel %vm811_vm5, %v807_v47, %v808_v48 }
 0x1d5   : > { %v734_v54 = vmul.f32 %v733_v53, %v655_v52  ;;  %v735_v58 = vmul.f32 %v733_v53, %v657_v57  ;;  %v817_v52 = vrot.slane %v699_v41, 1  ;;  %v815_v57 = vmax.f32 %v699_v41, %v812_v51 }
 0x1d7   : > { %736 = vadd.xlane.f32.xlu0 %v734_v54  ;;  %v813_v54 = vsel %vm811_vm5, -inf, %v807_v47  ;;  %v819_v26 = vsel %vm818_vm6, %v817_v52, -inf }
 0x1d8   : > { %v730_v56 = vpop.f32.mrf.mxu3 }
 0x1d9   : > { %v712_v56 = vpop.f32.mrf.mxu2 }
 0x1df   : > { %738 = vadd.xlane.f32.xlu0 %v735_v58 }
 0x24a   : > { %v737_v59 = vpop.xlane.xlu0 %736 }
 0x252   : > { %v739_v60 = vpop.xlane.xlu0 %738 }
 0x253   : > { %v740_v61 = vmax.f32 %v737_v59, %v739_v60 }
 0x255   : > { %v741_v62 = vrot.slane %v740_v61, 4 }
 0x257   : > { %v742_v63 = vmax.f32 %v740_v61, %v741_v62  ;;  %v801_v61 = vld [vmem:[#allocation2] sm:$0xff]  ;;  %v802_v62 = vld [vmem:[#allocation2 + $0x8] sm:$0xff] }
 0x259   : > { %v743_v0 = vrot.slane %v742_v63, 2 }
 0x25b   : > { %v744_v1 = vmax.f32 %v742_v63, %v743_v0  ;;  %v814_v63 = vmax.f32 %v697_v43, %v813_v54  ;;  %v713_v0 = vadd.f32 %v712_v56, %v384_v50 }
 0x25d   : > { %v745_v2 = vrot.slane %v744_v1, 1 }
 0x25f   : > { %v746_v3 = vmax.f32 %v744_v1, %v745_v2 }
 0x261   : > { %v747_v4 = vsub.f32 %v737_v59, %v746_v3  ;;  %v748_v5 = vsub.f32 %v739_v60, %v746_v3  ;;  %v711_v59 = vadd.f32 %v710_v40, %v384_v50  ;;  %v820_v60 = vsel %vm818_vm6, %v816_v55, %v817_v52 }
 0x262   : > { %v821_v3 = vmax.f32 %v814_v63, %v820_v60 }
 0x263   : > { %v749_v6 = vmul.f32 1.442695, %v747_v4  ;;  %v751_v7 = vmul.f32 1.442695, %v748_v5  ;;  %v822_v4 = vmax.f32 %v815_v57, %v819_v26 }
 0x265   : > { %1273 = vpow2.f32 %v749_v6 }
 0x266   : > { %1275 = vpow2.f32 %v751_v7 }
 0x26b   : > { %v1274_v8 = vpop.eup %1273 }
 0x26c   : > { %v1276_v9 = vpop.eup %1275 }
 0x26d   : > { %v753_v10 = vadd.f32 %v1276_v9, %v1274_v8 }
 0x26f   : > { %v754_v11 = vrot.slane %v753_v10, 4 }
 0x271   : > { %v755_v12 = vadd.f32 %v754_v11, %v753_v10 }
 0x273   : > { %v756_v13 = vrot.slane %v755_v12, 2 }
 0x275   : > { %v757_v14 = vadd.f32 %v756_v13, %v755_v12 }
 0x277   : > { %v758_v15 = vrot.slane %v757_v14, 1 }
 0x279   : > { %v759_v16 = vadd.f32 %v758_v15, %v757_v14 }
 0x27b   : > { %1277 = vrcp.f32 %v759_v16  ;;  %v771_v21 = vand.u32 2147483648, %v759_v16  ;;  %v769_v23 = vand.u32 2147483647, %v759_v16  ;;  %vm765_vm2 = vweird.f32 %v759_v16 }
 0x27d   : > { %v772_v27 = vor.u32 1.1754944e-38, %v771_v21  ;;  %vm770_vm4 = vcmp.eq.f32.partialorder %v769_v23, 8.507059e+37 }
 0x281   : > { %v1278_v17 = vpop.eup %1277 }
 0x282   : > { %v761_v18 = vmul.f32 %v1278_v17, %v759_v16  ;;  %vm766_vm1 = vweird.f32 %v1278_v17 }
 0x283   : > { %vm767_vm3 = vmor %vm765_vm2, %vm766_vm1 }
 0x284   : > { %v762_v20 = vsub.f32 1.0, %v761_v18 }
 0x286   : > { %v763_v22 = vmul.f32 %v1278_v17, %v762_v20 }
 0x288   : > { %v764_v25 = vadd.f32 %v1278_v17, %v763_v22 }
 0x28a   : > { %v768_v28 = vsel %vm767_vm3, %v1278_v17, %v764_v25 }
 0x28b   : > { %v773_v29 = vsel %vm770_vm4, %v772_v27, %v768_v28 }
 0x28c   : > { %v774_v32 = vmul.f32 %v1274_v8, %v773_v29  ;;  %v775_v33 = vmul.f32 %v1276_v9, %v773_v29 }
 0x28e   : > { %v776_v35 = vmul.f32 %v774_v32, %v669_v30  ;;  %v777_v36 = vmul.f32 %v775_v33, %v671_v31 }
 0x290   : > { %v778_v39 = vadd.f32 %v777_v36, %v776_v35 }
 0x292   : > { %v779_v42 = vrot.slane %v778_v39, 4 }
 0x294   : > { %v780_v45 = vadd.f32 %v779_v42, %v778_v39 }
 0x296   : > { %v781_v46 = vrot.slane %v780_v45, 2 }
 0x298   : > { %v782_v49 = vadd.f32 %v781_v46, %v780_v45 }
 0x29a   : > { %v783_v53 = vrot.slane %v782_v49, 1 }
 0x29c   : > { %v784_v58 = vadd.f32 %v783_v53, %v782_v49 }
 0x29e   : > { %v803_v1 = vadd.f32 %v801_v61, %v784_v58  ;;  %v804_v2 = vadd.f32 %v802_v62, %v784_v58 }
 0x2a0   : > { %v805_v5 = vmul.f32 %v803_v1, %v711_v59  ;;  %v806_v6 = vmul.f32 %v804_v2, %v713_v0 }
 0x2a2   : > { %v823_v7 = vadd.f32 %v821_v3, %v805_v5  ;;  %v824_v8 = vadd.f32 %v822_v4, %v806_v6 }
 0x2a4   : > { %v1195_v9 = vpack.c.bf16 %v824_v8, %v823_v7 }
 0x2a6   : > { %1196 = vst [vmem:[%s292_s12] sm:$0xff] %v1195_v9  }
 0x2a7 PF: > { %s1629_s13 = smov %s1540_s18  ;;  %p17_p4 = scmp.ge.s32.totalorder %s1540_s18, 4  }
 0x2a8   : > { %s1630_s18 = smov %s1433_s19  ;;  %s1631_s19 = smov %s1437_s20 }
 0x2a9   : > { %s1632_s20 = smov %s1550_s26  ;;  %s1633_s21 = smov %s1629_s13 }
 0x2aa   :  { %19 = sbr.rel (!%p17_p4) target bundleno = 5 (0x5), region = 95 }
 0x2af   :  { %850 = vsyncpa [#allocation4], 1 }
 0x2b0   :  { %852 = vsyncpa [#allocation4 + $0x1], 1 }
 0x2b1   :  { %853 = vsyncpa [#allocation6], 1 }
 0x2b2   :  { %854 = vsyncpa [#allocation9], 1 }

</bundles_post_ra>
